<compile_context>
chip_gen: v7x
topology: tpu7x:2x2x1
jax: 0.10.0
libtpu: 0.0.40
codegen_flags: <defaults>
</compile_context>

<pallas_src>
import jax
import jax.numpy as jnp
from jax.experimental import pallas as pl
from jax.experimental.pallas import tpu as pltpu


def _onehot_gather_kernel(idx_ref, tbl_ref, out_ref):
    """out[r, :] = table[idx[r], :] via a one-hot MXU matmul.

    idx_ref : (block_rows, 1) int32  -- combined row index per node (VMEM)
    tbl_ref : (R_total, E)   float32 -- whole lookup table, VMEM-resident
    out_ref : (block_rows, E) float32
    """
    bm = idx_ref.shape[0]
    n_rows = tbl_ref.shape[0]
    row_ids = jax.lax.broadcasted_iota(jnp.int32, (bm, n_rows), 1)
    one_hot = (idx_ref[...] == row_ids).astype(jnp.float32)        # (bm, R)
    # 0/1 x f32 with HIGHEST precision -> exact row selection on the MXU.
    out_ref[...] = jnp.dot(one_hot, tbl_ref[...],
                           preferred_element_type=jnp.float32,
                           precision=jax.lax.Precision.HIGHEST)


def rel_graph_embed(node_ids, node_tids, type_ids,
                    feat0, w0, feat1, w1, emb_tbl, *, block_rows=256):
    n = node_ids.shape[0]
    e = emb_tbl.shape[1]
    block_rows = min(block_rows, n)
    assert n % block_rows == 0

    # --- wrapper-side pre-projection (hoisted out of the kernel) -------------
    # In a real training loop this table only needs rebuilding when the weights
    # change; here it is a cheap unpadded concat (no 128-lane padding pass).
    p0 = jnp.dot(feat0, w0, preferred_element_type=jnp.float32)     # (rows0, E)
    p1 = jnp.dot(feat1, w1, preferred_element_type=jnp.float32)     # (rows1, E)
    table = jnp.concatenate([p0, p1, emb_tbl.astype(jnp.float32)], axis=0)
    r_total = table.shape[0]

    # VMEM-resident fast path only (see TODO in header for the HBM fallback).
    assert r_total * e * 4 <= 4 * 1024 * 1024, "table too large for VMEM path"

    # --- one combined row index per node (type offset + per-type id) ---------
    off1 = p0.shape[0]
    off2 = off1 + p1.shape[0]
    idx = jnp.where(node_tids == 0, type_ids,
          jnp.where(node_tids == 1, type_ids + off1,
                    node_ids + off2)).astype(jnp.int32)
    idx2d = idx[:, None]                                            # (n, 1)

    return pl.pallas_call(
        _onehot_gather_kernel,
        out_shape=jax.ShapeDtypeStruct((n, e), jnp.float32),
        grid=(n // block_rows,),
        in_specs=[
            pl.BlockSpec((block_rows, 1), lambda i: (i, 0)),        # indices
            pl.BlockSpec((r_total, e), lambda i: (0, 0)),           # whole table
        ],
        out_specs=pl.BlockSpec((block_rows, e), lambda i: (i, 0)),
        compiler_params=pltpu.CompilerParams(
            dimension_semantics=("parallel",)),
    )(idx2d, table)


def ref_forward(node_ids, node_tids, type_ids, feat0, w0, feat1, w1, emb_tbl):
    """Pure-JAX reference matching the PyTorch forward."""
    idx0 = jnp.where(node_tids == 0, type_ids, 0)
    idx1 = jnp.where(node_tids == 1, type_ids, 0)
    p0 = feat0[idx0] @ w0
    p1 = feat1[idx1] @ w1
    e2 = emb_tbl[node_ids]
    tid = node_tids[:, None]
    return jnp.where(tid == 0, p0, jnp.where(tid == 1, p1, e2))


if __name__ == "__main__":
    key = jax.random.PRNGKey(0)
    ks = jax.random.split(key, 9)

    N = 512           # nodes to embed in this forward pass (2 x 256-row blocks)
    NUM_NODES = 128   # rows of the learned node-embedding table
    E = 32            # embed_size
    D0, ROWS0 = 16, 40   # ntype 0: input feature dim / feature-table rows
    D1, ROWS1 = 24, 24   # ntype 1: input feature dim / feature-table rows
    NUM_NTYPE = 3        # ntype 2 is featureless (uses node_embeds lookup)

    # ---- parameters (deterministic init mirroring the module's __init__) ----
    def xavier(k, fan_in, fan_out):
        lim = (6.0 / (fan_in + fan_out)) ** 0.5
        return jax.random.uniform(k, (fan_in, fan_out), jnp.float32, -lim, lim)

    w0 = xavier(ks[0], D0, E)
    w1 = xavier(ks[1], D1, E)
    emb_tbl = jax.random.uniform(ks[2], (NUM_NODES, E), jnp.float32, -1.0, 1.0)

    # ---- forward inputs ----
    feat0 = jax.random.normal(ks[3], (ROWS0, D0), jnp.float32)
    feat1 = jax.random.normal(ks[4], (ROWS1, D1), jnp.float32)
    node_tids = jax.random.randint(ks[5], (N,), 0, NUM_NTYPE, jnp.int32)
    tid0_idx = jax.random.randint(ks[6], (N,), 0, ROWS0, jnp.int32)
    tid1_idx = jax.random.randint(ks[7], (N,), 0, ROWS1, jnp.int32)
    type_ids = jnp.where(node_tids == 0, tid0_idx,
                         jnp.where(node_tids == 1, tid1_idx, 0))
    node_ids = jax.random.randint(ks[8], (N,), 0, NUM_NODES, jnp.int32)

    out = rel_graph_embed(node_ids, node_tids, type_ids,
                          feat0, w0, feat1, w1, emb_tbl)
    out = jax.block_until_ready(out)

    ref = ref_forward(node_ids, node_tids, type_ids, feat0, w0, feat1, w1, emb_tbl)
    assert out.shape == (N, E) and out.dtype == jnp.float32
    assert jnp.allclose(out, ref, rtol=1e-5, atol=1e-5), "mismatch vs reference"
    print("KERNEL_OK")
</pallas_src>

<mosaic_0001>
module attributes {stable_mosaic.version = 11 : i64} {
  func.func @_onehot_gather_kernel(%arg0: i32, %arg1: memref<256x1xi32, #tpu.memory_space<vmem>>, %arg2: memref<192x32xf32, #tpu.memory_space<vmem>>, %arg3: memref<256x32xf32, #tpu.memory_space<vmem>>) attributes {dimension_semantics = [#tpu.dimension_semantics<parallel>], iteration_bounds = array<i64: 2>, scalar_prefetch = 0 : i64, scratch_operands = 0 : i64, tpu.core_type = #tpu.core_type<tc>, window_params = [{transform_indices = @transform_0, window_bounds = array<i64: 256, 1>}, {pipeline_mode = #tpu.pipeline_mode<synchronous>, transform_indices = @transform_1, window_bounds = array<i64: 192, 32>}, {transform_indices = @transform_2, window_bounds = array<i64: 256, 32>}]} {
    %0 = tpu.iota {dimensions = array<i32: 1>} : vector<256x192xi32>
    %c0 = arith.constant 0 : index
    %c0_0 = arith.constant 0 : index
    %1 = vector.load %arg1[%c0, %c0_0] : memref<256x1xi32, #tpu.memory_space<vmem>>, vector<256x1xi32>
    %2 = vector.broadcast %1 : vector<256x1xi32> to vector<256x192xi32>
    %3 = arith.cmpi eq, %2, %0 : vector<256x192xi32>
    %4 = arith.extui %3 : vector<256x192xi1> to vector<256x192xi32>
    %5 = arith.sitofp %4 : vector<256x192xi32> to vector<256x192xf32>
    %c0_1 = arith.constant 0 : index
    %c0_2 = arith.constant 0 : index
    %6 = vector.load %arg2[%c0_1, %c0_2] : memref<192x32xf32, #tpu.memory_space<vmem>>, vector<192x32xf32>
    %cst = arith.constant dense<0.000000e+00> : vector<256x32xf32>
    %7 = tpu.matmul %5, %6, %cst {dimension_numbers = #tpu.dot_dimension_numbers<[1], [0], [0], [1], [0, 0, 1, 1], [], []>, precision = #tpu.contract_precision<fp32>} : vector<256x192xf32>, vector<192x32xf32>, vector<256x32xf32> -> vector<256x32xf32>
    %c0_3 = arith.constant 0 : index
    %c0_4 = arith.constant 0 : index
    %8 = vector.load %arg3[%c0_3, %c0_4] : memref<256x32xf32, #tpu.memory_space<vmem>>, vector<256x32xf32>
    tpu.vector_store %arg3[%c0_3, %c0_4], %7 {strides = array<i32>} : memref<256x32xf32, #tpu.memory_space<vmem>>, vector<256x32xf32>,
    return
  }
  func.func @transform_0(%arg0: i32) -> (i32, i32) {
    %c0_i32 = arith.constant 0 : i32
    %c0_i32_0 = arith.constant 0 : i32
    return %arg0, %c0_i32 : i32, i32
  }
  func.func @transform_1(%arg0: i32) -> (i32, i32) {
    %c0_i32 = arith.constant 0 : i32
    %c0_i32_0 = arith.constant 0 : i32
    %c0_i32_1 = arith.constant 0 : i32
    return %c0_i32, %c0_i32_0 : i32, i32
  }
  func.func @transform_2(%arg0: i32) -> (i32, i32) {
    %c0_i32 = arith.constant 0 : i32
    %c0_i32_0 = arith.constant 0 : i32
    return %arg0, %c0_i32 : i32, i32
  }
}

</mosaic_0001>

<bundles_post_ra>
// kernel: tpu_custom_call.1
= control target key start
LH: loop header
LB: loop body
LE: loop exit
PB: predicated region body
PF: predicated region fallthrough
CT: control target
= control target key end

     0   :  { %s3986_s9 = smov 0   ;;  %s5981_s0 = inlined_call_operand.vmem [shape: s32[512,1], index: 0, kind: input, shape index: {}]   ;;  %s5982_s1 = inlined_call_operand.vmem [shape: f32[192,32], index: 1, kind: input, shape index: {}]   ;;  %s5983_s2 = inlined_call_operand.vmem [shape: f32[512,32], index: 2, kind: output, shape index: {}]  }
   0x1 LB: > { %s3174_s10 = sadd.s32 4294967295, %s3965_s9   ;;  %p3178_p0 = scmp.ge.s32.totalorder %s3965_s9, 1  ;;  %s3965_s9 = sphi %s3986_s9, %s12_s9  }
   0x2   : > { %p113_p1 = scmp.lt.s32.totalorder %s3965_s9, 3 }
   0x4   : > { %p114_p2 = pnand %p3178_p0, %p113_p1 }
   0x6   : > { %117 = sbr.rel (%p114_p2) target bundleno = 763 (0x2fb), region = 28 }
   0xd   : > { %s3179_s11 = sshll.u32 %s3174_s10, 5  ;;  %v470_v0 = vld [vmem:[%s5982_s1] sm:$0xff]  ;;  %v471_v1 = vld [vmem:[%s5982_s1 + $0x8] sm:$0xff]  ;;  %v472_v2 = vld [vmem:[%s5982_s1 + $0x10] sm:$0xff]  ;;  %v3967_v3 = vmov 0   ;;  %v5984_v9 = vmov 0.0|0.0  }
   0xe   : > { %3958 = vset.pattern.permute.xlu1 %v3967_v3  ;;  %3957 = vset.pattern.permute.xlu0 %v3967_v3  ;;  %p136_p3 = scmp.lt.s32.totalorder %s3179_s11, 63  ;;  %v592_v4 = vand.u32 4294901760, %v470_v0  ;;  %v595_v5 = vand.u32 4294901760, %v471_v1  ;;  %v473_v6 = vld [vmem:[%s5982_s1 + $0x18] sm:$0xff]  ;;  %v598_v7 = vand.u32 4294901760, %v472_v2  ;;  %v474_v8 = vld [vmem:[%s5982_s1 + $0x20] sm:$0xff] }
   0xf   : > { %3549 = vmatprep.subr.bf16.mxu0 %v5984_v9  ;;  %3441 = vmatprep.subr.bf16.mxu1 %v5984_v9  ;;  %v601_v10 = vand.u32 4294901760, %v473_v6  ;;  %v475_v11 = vld [vmem:[%s5982_s1 + $0x28] sm:$0xff]  ;;  %v604_v12 = vand.u32 4294901760, %v474_v8  ;;  %v4017_v13 = vld [vmem:[%s5982_s1 + $0x30] sm:$0xff]  ;;  %v4022_v14 = vld [vmem:[%s5982_s1 + $0x38] sm:$0xff]  ;;  %vm494_vm0 = vcmask 523264  }
  0x10   : > { %s6480_s11 = smov (!%p136_p3, %s3179_s11), 63  ;;  %v4027_v15 = vpack.c.bf16 %v595_v5, %v592_v4  ;;  %v4029_v16 = vsub.f32 %v470_v0, %v592_v4  ;;  %v4031_v17 = vsub.f32 %v471_v1, %v595_v5  ;;  %v4033_v18 = vsub.f32 %v472_v2, %v598_v7  ;;  %v4038_v19 = vld [vmem:[%s5982_s1 + $0x40] sm:$0xff]  ;;  %v4043_v20 = vld [vmem:[%s5982_s1 + $0x48] sm:$0xff]  ;;  %v4052_v24 = vld [vmem:[%s5982_s1 + $0x50] sm:$0xff] }
  0x11   : > { %v4045_v21 = vsub.f32 %v473_v6, %v601_v10  ;;  %v607_v22 = vand.u32 4294901760, %v475_v11  ;;  %v4047_v23 = vsub.f32 %v474_v8, %v604_v12  ;;  %v4057_v25 = vld [vmem:[%s5982_s1 + $0x58] sm:$0xff]  ;;  %s3180_s8 = sshll.u32 %s6480_s11, 3  ;;  %v4062_v26 = vpack.c.bf16 %v601_v10, %v598_v7  ;;  %v4069_v29 = vld [vmem:[%s5982_s1 + $0x60] sm:$0xff]  ;;  %v4087_v33 = vld [vmem:[%s5982_s1 + $0x68] sm:$0xff] }
  0x12   : > { %3551 = vmatpush1.bf16.msra.mxu0 %v4027_v15  ;;  %3443 = vmatpush1.bf16.msra.mxu1 %v4027_v15  ;;  %v610_v27 = vand.u32 4294901760, %v4017_v13  ;;  %v613_v28 = vand.u32 4294901760, %v4022_v14  ;;  %s4076_s15 = scalar_lea.vmem %s5981_s0, %s3180_s8  ;;  %v616_v31 = vand.u32 4294901760, %v4038_v19  ;;  %v619_v32 = vand.u32 4294901760, %v4043_v20  ;;  %v4092_v34 = vld [vmem:[%s5982_s1 + $0x70] sm:$0xff]  ;;  %v4107_v41 = vld [vmem:[%s5982_s1 + $0x78] sm:$0xff] }
  0x13   : > { %6174 = vst [vmem:[#allocation2_spill] sm:$0xff] %v4047_v23  ;;  %3552 = vmatprep.subr.bf16.mxu0 %v5984_v9  ;;  %3444 = vmatprep.subr.bf16.mxu1 %v5984_v9  ;;  %v4080_v30 = vsub.f32 %v475_v11, %v607_v22  ;;  %v152_v35 = vld [vmem:[%s4076_s15 + $0x10] sm:$0xff]  ;;  %v150_v36 = vld [vmem:[%s4076_s15] sm:$0xff]  ;;  %v622_v39 = vand.u32 4294901760, %v4052_v24  ;;  %v625_v40 = vand.u32 4294901760, %v4057_v25  ;;  %v4109_v42 = vpack.c.bf16 %v607_v22, %v604_v12  ;;  %v4126_v47 = vld [vmem:[%s5982_s1 + $0x88] sm:$0xff] }
  0x14   : > { %v4097_v37 = vsub.f32 %v4017_v13, %v610_v27  ;;  %v4100_v38 = vsub.f32 %v4022_v14, %v613_v28  ;;  %189 = vperm.xlu1 %3958, %v152_v35   ;;  %183 = vperm.xlu0 %3957, %v150_v36   ;;  %v4112_v43 = vsub.f32 %v4038_v19, %v616_v31  ;;  %v628_v45 = vand.u32 4294901760, %v4069_v29  ;;  %v4121_v46 = vld [vmem:[%s5982_s1 + $0x80] sm:$0xff]  ;;  %v153_v48 = vld [vmem:[%s4076_s15 + $0x18] sm:$0xff]  ;;  %v151_v49 = vld [vmem:[%s4076_s15 + $0x8] sm:$0xff] }
  0x15   : > { %6175 = vst [vmem:[#allocation3_spill] sm:$0xff] %v4080_v30  ;;  %6178 = vst [vmem:[#allocation6_spill] sm:$0xff] %v4109_v42  ;;  %v4115_v44 = vsub.f32 %v4043_v20, %v619_v32  ;;  %v4135_v50 = vsub.f32 %v4052_v24, %v622_v39  ;;  %v4140_v51 = vsub.f32 %v4057_v25, %v625_v40  ;;  %v631_v52 = vand.u32 4294901760, %v4087_v33  ;;  %v155_v61 = vld [vmem:[%s4076_s15 + $0x28] sm:$0xff]  ;;  %v154_v62 = vld [vmem:[%s4076_s15 + $0x20] sm:$0xff] }
  0x16   : > { %6176 = vst [vmem:[#allocation4_spill] sm:$0xff] %v4097_v37  ;;  %6177 = vst [vmem:[#allocation5_spill] sm:$0xff] %v4100_v38  ;;  %3554 = vmatpush1.bf16.msra.mxu0 %v4062_v26  ;;  %3446 = vmatpush1.bf16.msra.mxu1 %v4062_v26  ;;  %v634_v53 = vand.u32 4294901760, %v4092_v34  ;;  %v4149_v54 = vsub.f32 %v4069_v29, %v628_v45  ;;  %v637_v55 = vand.u32 4294901760, %v4107_v41  ;;  %v640_v58 = vand.u32 4294901760, %v4121_v46  ;;  %v157_v2 = vld [vmem:[%s4076_s15 + $0x38] sm:$0xff] }
  0x17   : > { %6179 = vst [vmem:[#allocation7_spill] sm:$0xff] %v4112_v43  ;;  %3555 = vmatprep.subr.bf16.mxu0 %v5984_v9  ;;  %3447 = vmatprep.subr.bf16.mxu1 %v5984_v9  ;;  %v4155_v56 = vsub.f32 %v4087_v33, %v631_v52  ;;  %v643_v59 = vand.u32 4294901760, %v4126_v47  ;;  %v4173_v63 = vpack.c.bf16 %v613_v28, %v610_v27  ;;  %v156_v3 = vld [vmem:[%s4076_s15 + $0x30] sm:$0xff]  ;;  %v489_v6 = vld [vmem:[%s5982_s1 + $0x98] sm:$0xff]  ;;  %v4207_v8 = vld [vmem:[%s5982_s1 + $0xa0] sm:$0xff] }
  0x18   : > { %6180 = vst [vmem:[#allocation8_spill] sm:$0xff] %v4149_v54  ;;  %v4160_v57 = vsub.f32 %v4092_v34, %v634_v53  ;;  %192 = vperm.xlu1 %3958, %v153_v48   ;;  %186 = vperm.xlu0 %3957, %v151_v49   ;;  %v4167_v60 = vsub.f32 %v4107_v41, %v637_v55  ;;  %v4196_v5 = vld [vmem:[%s5982_s1 + $0x90] sm:$0xff]  ;;  %v4212_v10 = vld [vmem:[%s5982_s1 + $0xa8] sm:$0xff]  ;;  %v649_v11 = vand.u32 4294901760, %v489_v6  ;;  %v4222_v13 = vld [vmem:[%s5982_s1 + $0xb8] sm:$0xff]  ;;  %v652_v19 = vand.u32 4294901760, %v4207_v8 }
  0x19   : > { %6181 = vst [vmem:[#allocation9_spill] sm:$0xff] %v4155_v56  ;;  %6184 = vst [vmem:[#allocation12_spill] sm:$0xff] %v4173_v63  ;;  %v4178_v0 = vsub.f32 %v4121_v46, %v640_v58  ;;  %v4183_v1 = vsub.f32 %v4126_v47, %v643_v59  ;;  %v4191_v4 = vpack.c.bf16 %v619_v32, %v616_v31  ;;  %v646_v7 = vand.u32 4294901760, %v4196_v5  ;;  %v4217_v12 = vld [vmem:[%s5982_s1 + $0xb0] sm:$0xff]  ;;  %v159_v22 = vld [vmem:[%s4076_s15 + $0x48] sm:$0xff] }
  0x1a   : > { %6182 = vst [vmem:[#allocation10_spill] sm:$0xff] %v4160_v57  ;;  %6183 = vst [vmem:[#allocation11_spill] sm:$0xff] %v4167_v60  ;;  %3557 = vmatpush1.bf16.msra.mxu0 %v4109_v42  ;;  %3449 = vmatpush1.bf16.msra.mxu1 %v4109_v42  ;;  %v655_v20 = vand.u32 4294901760, %v4212_v10  ;;  %v158_v27 = vld [vmem:[%s4076_s15 + $0x40] sm:$0xff]  ;;  %v4237_v28 = vpack.c.bf16 %v625_v40, %v622_v39  ;;  %v4239_v31 = vsub.f32 %v489_v6, %v649_v11  ;;  %v161_v40 = vld [vmem:[%s4076_s15 + $0x58] sm:$0xff] }
  0x1b   : > { %6185 = vst [vmem:[#allocation13_spill] sm:$0xff] %v4178_v0  ;;  %6186 = vst [vmem:[#allocation14_spill] sm:$0xff] %v4183_v1  ;;  %3558 = vmatprep.subr.bf16.mxu0 %v5984_v9  ;;  %3450 = vmatprep.subr.bf16.mxu1 %v5984_v9  ;;  %v4225_v14 = vsub.f32 %v4196_v5, %v646_v7  ;;  %v658_v32 = vand.u32 4294901760, %v4217_v12  ;;  %v661_v35 = vand.u32 4294901760, %v4222_v13  ;;  %v160_v48 = vld [vmem:[%s4076_s15 + $0x50] sm:$0xff]  ;;  %v165_v33 = vld [vmem:[%s4076_s15 + $0x78] sm:$0xff] }
  0x1c   : > { %198 = vperm.xlu1 %3958, %v155_v61   ;;  %195 = vperm.xlu0 %3957, %v154_v62   ;;  %6187 = vst [vmem:[#allocation15_spill] sm:$0xff] %v4191_v4  ;;  %6188 = vst [vmem:[#allocation16_spill] sm:$0xff] %v4237_v28  ;;  %v4246_v36 = vsub.f32 %v4207_v8, %v652_v19  ;;  %v4249_v24 = vsub.f32 %v4212_v10, %v655_v20  ;;  %v163_v61 = vld [vmem:[%s4076_s15 + $0x68] sm:$0xff]  ;;  %v162_v62 = vld [vmem:[%s4076_s15 + $0x60] sm:$0xff]  ;;  %v1205_v42 = vand.u32 4294901760, %v4097_v37 }
  0x1d   : > { %v4252_v25 = vsub.f32 %v4217_v12, %v658_v32  ;;  %v4255_v39 = vsub.f32 %v4222_v13, %v661_v35  ;;  %v4265_v49 = vpack.c.bf16 %v631_v52, %v628_v45  ;;  %v4277_v29 = vpack.c.bf16 %v637_v55, %v634_v53  ;;  %v164_v45 = vld [vmem:[%s4076_s15 + $0x70] sm:$0xff]  ;;  %v167_v41 = vld [vmem:[%s4076_s15 + $0x88] sm:$0xff]  ;;  %v166_v52 = vld [vmem:[%s4076_s15 + $0x80] sm:$0xff] }
  0x1e   : > { %3560 = vmatpush1.bf16.msra.mxu0 %v4173_v63  ;;  %3452 = vmatpush1.bf16.msra.mxu1 %v4173_v63  ;;  %v4289_v34 = vpack.c.bf16 %v643_v59, %v640_v58  ;;  %v4297_v46 = vpack.c.bf16 %v649_v11, %v646_v7  ;;  %v169_v47 = vld [vmem:[%s4076_s15 + $0x98] sm:$0xff]  ;;  %v168_v53 = vld [vmem:[%s4076_s15 + $0x90] sm:$0xff]  ;;  %v4305_v55 = vpack.c.bf16 %v655_v20, %v652_v19  ;;  %v171_v58 = vld [vmem:[%s4076_s15 + $0xa8] sm:$0xff]  ;;  %v147_v20 = vlaneseq }
  0x1f   : > { %3561 = vmatprep.subr.bf16.mxu0 %v5984_v9  ;;  %3453 = vmatprep.subr.bf16.mxu1 %v5984_v9  ;;  %6189 = vst [vmem:[#allocation17_spill] sm:$0xff] %v4265_v49  ;;  %6190 = vst [vmem:[#allocation18_spill] sm:$0xff] %v4277_v29  ;;  %v170_v59 = vld [vmem:[%s4076_s15 + $0xa0] sm:$0xff]  ;;  %v172_v5 = vld [vmem:[%s4076_s15 + $0xb0] sm:$0xff] }
  0x20   : > { %204 = vperm.xlu1 %3958, %v157_v2   ;;  %201 = vperm.xlu0 %3957, %v156_v3   ;;  %6191 = vst [vmem:[#allocation19_spill] sm:$0xff] %v4289_v34  ;;  %6192 = vst [vmem:[#allocation20_spill] sm:$0xff] %v4297_v46  ;;  %v4313_v2 = vpack.c.bf16 %v661_v35, %v658_v32  ;;  %v173_v3 = vld [vmem:[%s4076_s15 + $0xb8] sm:$0xff]  ;;  %v175_v6 = vld [vmem:[%s4076_s15 + $0xc8] sm:$0xff]  ;;  %v1163_v32 = vand.u32 4294901760, %v4029_v16  ;;  %v1170_v35 = vand.u32 4294901760, %v4031_v17 }
  0x21   : > { %6193 = vst [vmem:[#allocation21_spill] sm:$0xff] %v4305_v55  ;;  %v174_v7 = vld [vmem:[%s4076_s15 + $0xc0] sm:$0xff]  ;;  %v177_v8 = vld [vmem:[%s4076_s15 + $0xd8] sm:$0xff]  ;;  %v176_v10 = vld [vmem:[%s4076_s15 + $0xd0] sm:$0xff] }
  0x22   : > { %3563 = vmatpush1.bf16.msra.mxu0 %v4191_v4  ;;  %3455 = vmatpush1.bf16.msra.mxu1 %v4191_v4  ;;  %6194 = vst [vmem:[#allocation22_spill] sm:$0xff] %v4313_v2  ;;  %v179_v11 = vld [vmem:[%s4076_s15 + $0xe8] sm:$0xff]  ;;  %v178_v12 = vld [vmem:[%s4076_s15 + $0xe0] sm:$0xff]  ;;  %v181_v13 = vld [vmem:[%s4076_s15 + $0xf8] sm:$0xff]  ;;  %v6200_v4 = vmov 0.0|0.0  }
  0x23   : > { %3564 = vmatprep.subr.bf16.mxu0 %v5984_v9  ;;  %3456 = vmatprep.subr.bf16.mxu1 %v5984_v9  ;;  %v180_v19 = vld [vmem:[%s4076_s15 + $0xf0] sm:$0xff]  ;;  %s5912_s15 = scalar_lea.vmem %s5983_s2, %s3180_s8 }
  0x24   : > { %210 = vperm.xlu1 %3958, %v159_v22   ;;  %207 = vperm.xlu0 %3957, %v158_v27   ;;  %v4331_v22 = vand.u32 127, %v147_v20 }
  0x26   : > { %3566 = vmatpush1.bf16.msra.mxu0 %v4237_v28  ;;  %3458 = vmatpush1.bf16.msra.mxu1 %v4237_v28  ;;  %v4334_v27 = vadd.s32 128, %v4331_v22 }
  0x27   : > { %3567 = vmatprep.subr.bf16.mxu0 %v5984_v9  ;;  %3459 = vmatprep.subr.bf16.mxu1 %v5984_v9 }
  0x28   : > { %216 = vperm.xlu1 %3958, %v161_v40   ;;  %213 = vperm.xlu0 %3957, %v160_v48   ;;  %v1177_v48 = vand.u32 4294901760, %v4033_v18 }
  0x2a   : > { %3569 = vmatpush1.bf16.msra.mxu0 %v4265_v49  ;;  %3461 = vmatpush1.bf16.msra.mxu1 %v4265_v49 }
  0x2b   : > { %3570 = vmatprep.subr.bf16.mxu0 %v5984_v9  ;;  %3462 = vmatprep.subr.bf16.mxu1 %v5984_v9 }
  0x2c   : > { %222 = vperm.xlu1 %3958, %v163_v61   ;;  %219 = vperm.xlu0 %3957, %v162_v62   ;;  %v1184_v61 = vand.u32 4294901760, %v4045_v21 }
  0x2e   : > { %3572 = vmatpush1.bf16.msra.mxu0 %v4277_v29  ;;  %3464 = vmatpush1.bf16.msra.mxu1 %v4277_v29 }
  0x2f   : > { %3573 = vmatprep.subr.bf16.mxu0 %v5984_v9  ;;  %3465 = vmatprep.subr.bf16.mxu1 %v5984_v9 }
  0x30   : > { %228 = vperm.xlu1 %3958, %v165_v33   ;;  %225 = vperm.xlu0 %3957, %v164_v45   ;;  %v5996_v33 = vmov 0.0  }
  0x32   : > { %3575 = vmatpush1.bf16.msra.mxu0 %v4289_v34  ;;  %3467 = vmatpush1.bf16.msra.mxu1 %v4289_v34 }
  0x33   : > { %3576 = vmatprep.subr.bf16.mxu0 %v5984_v9  ;;  %3468 = vmatprep.subr.bf16.mxu1 %v5984_v9 }
  0x34   : > { %234 = vperm.xlu1 %3958, %v167_v41   ;;  %231 = vperm.xlu0 %3957, %v166_v52   ;;  %v1164_v52 = vsub.f32 %v4029_v16, %v1163_v32 }
  0x36   : > { %3578 = vmatpush1.bf16.msra.mxu0 %v4297_v46  ;;  %3470 = vmatpush1.bf16.msra.mxu1 %v4297_v46 }
  0x37   : > { %3579 = vmatprep.subr.bf16.mxu0 %v5984_v9  ;;  %3471 = vmatprep.subr.bf16.mxu1 %v5984_v9 }
  0x38   : > { %240 = vperm.xlu1 %3958, %v169_v47   ;;  %237 = vperm.xlu0 %3957, %v168_v53   ;;  %v1171_v53 = vsub.f32 %v4031_v17, %v1170_v35 }
  0x3a   : > { %3581 = vmatpush1.bf16.msra.mxu0 %v4305_v55  ;;  %3473 = vmatpush1.bf16.msra.mxu1 %v4305_v55 }
  0x3b   : > { %3582 = vmatprep.subr.bf16.mxu0 %v5984_v9  ;;  %3474 = vmatprep.subr.bf16.mxu1 %v5984_v9 }
  0x3c   : > { %246 = vperm.xlu1 %3958, %v171_v58   ;;  %243 = vperm.xlu0 %3957, %v170_v59   ;;  %v1191_v58 = vand.u32 4294901760, %v4047_v23  ;;  %v1198_v59 = vand.u32 4294901760, %v4080_v30 }
  0x3e   : > { %3584 = vmatpush1.bf16.msra.mxu0 %v4313_v2  ;;  %3476 = vmatpush1.bf16.msra.mxu1 %v4313_v2  ;;  %v1192_v20 = vsub.f32 %v4047_v23, %v1191_v58 }
  0x3f   : > { %3477 = vmatprep.subr.bf16.mxu1 %v5984_v9  ;;  %3585 = vmatprep.subr.bf16.mxu0 %v5984_v9 }
  0x40   : > { %252 = vperm.xlu1 %3958, %v173_v3   ;;  %249 = vperm.xlu0 %3957, %v172_v5   ;;  %v1193_v34 = vand.u32 4294901760, %v1192_v20  ;;  %v1212_v20 = vand.u32 4294901760, %v4100_v38 }
  0x44   : > { %258 = vperm.xlu1 %3958, %v175_v6   ;;  %255 = vperm.xlu0 %3957, %v174_v7   ;;  %v1178_v6 = vsub.f32 %v4033_v18, %v1177_v48 }
  0x46   : > { %v1179_v46 = vand.u32 4294901760, %v1178_v6 }
  0x48   : > { %264 = vperm.xlu1 %3958, %v177_v8   ;;  %261 = vperm.xlu0 %3957, %v176_v10   ;;  %v1185_v8 = vsub.f32 %v4045_v21, %v1184_v61 }
  0x4c   : > { %270 = vperm.xlu1 %3958, %v179_v11   ;;  %267 = vperm.xlu0 %3957, %v178_v12   ;;  %v1165_v11 = vand.u32 4294901760, %v1164_v52  ;;  %v3586_v12 = vpack.c.bf16 %v1170_v35, %v1163_v32  ;;  %v1186_v52 = vand.u32 4294901760, %v1185_v8 }
  0x4e   : > { %v4411_v63 = vpack.c.bf16 %v1186_v52, %v1179_v46 }
  0x50   : > { %276 = vperm.xlu1 %3958, %v181_v13   ;;  %273 = vperm.xlu0 %3957, %v180_v19   ;;  %v1172_v19 = vand.u32 4294901760, %v1171_v53  ;;  %v3589_v53 = vpack.c.bf16 %v1184_v61, %v1177_v48 }
  0x52   : > { %v3478_v61 = vpack.c.bf16 %v1172_v19, %v1165_v11  ;;  %v1219_v19 = vand.u32 4294901760, %v4112_v43 }
  0x93   : > { %v4338_v40 = vpop.permute.xlu0 %183  ;;  %v4346_v62 = vpop.permute.xlu1 %189 }
  0x94   : > { %vm278_vm1 = vcmp.eq.s32.totalorder %v4338_v40, %v4331_v22  ;;  %vm279_vm2 = vcmp.eq.s32.totalorder %v4338_v40, %v4334_v27  ;;  %vm283_vm3 = vcmp.eq.s32.totalorder %v4346_v62, %v4334_v27  ;;  %vm282_vm7 = vcmp.eq.s32.totalorder %v4346_v62, %v4331_v22 }
  0x95   : > { %v3183_v45 = vsel %vm278_vm1, 1.0, %v5996_v33  ;;  %v4353_v41 = vsel %vm279_vm2, 1.0, %v5996_v33 }
  0x96   : > { %v496_v47 = vsel %vm494_vm0, %v4353_v41, 0  ;;  %v4368_v7 = vsub.f32 %v3183_v45, %v3183_v45  ;;  %v1199_v45 = vsub.f32 %v4080_v30, %v1198_v59 }
  0x97   : > { %v4361_v3 = vpop.permute.xlu0 %186  ;;  %v4363_v5 = vsub.f32 %v496_v47, %v496_v47  ;;  %v4383_v47 = vsel %vm283_vm3, 1.0, %v5996_v33  ;;  %v4385_v9 = vpop.permute.xlu1 %192 }
  0x98   : > { %6196 = vst [vmem:[#allocation24_spill] sm:$0xff] %v4368_v7  ;;  %vm281_vm4 = vcmp.eq.s32.totalorder %v4361_v3, %v4334_v27  ;;  %vm280_vm5 = vcmp.eq.s32.totalorder %v4361_v3, %v4331_v22  ;;  %6197 = vst [vmem:[#allocation25_spill] sm:$0xff] %v4385_v9  ;;  %vm285_vm6 = vcmp.eq.s32.totalorder %v4385_v9, %v4334_v27  ;;  %v687_v35 = vand.u32 4294901760, %v4368_v7 }
  0x99   : > { %6195 = vst [vmem:[#allocation23_spill] sm:$0xff] %v4363_v5  ;;  %v4376_v10 = vsel %vm281_vm4, 1.0, %v5996_v33  ;;  %v681_v55 = vand.u32 4294901760, %v4363_v5  ;;  %v3185_v32 = vsel %vm280_vm5, 1.0, %v5996_v33  ;;  %v1200_v29 = vand.u32 4294901760, %v1199_v45 }
  0x9a   : > { %v499_v13 = vsel %vm494_vm0, %v4376_v10, 0  ;;  %v4404_v49 = vsel %vm285_vm6, 1.0, %v5996_v33  ;;  %v4406_v28 = vsub.f32 %v3185_v32, %v3185_v32  ;;  %v3187_v45 = vsel %vm282_vm7, 1.0, %v5996_v33 }
  0x9b   : > { %v4387_v2 = vsub.f32 %v499_v13, %v499_v13  ;;  %2061 = vmatprep.mubr.f32.mxu0 %v681_v55  ;;  %v502_v13 = vsel %vm494_vm0, %v4383_v47, 0  ;;  %v4401_v6 = vpop.permute.xlu0 %195  ;;  %v682_v8 = vsub.f32 %v4363_v5, %v681_v55  ;;  %v505_v46 = vsel %vm494_vm0, %v4404_v49, 0  ;;  %v4430_v52 = vpop.permute.xlu1 %198 }
  0x9c   : > { %2065 = vmatmul.mubr.f32.vlgmr.msra.gmra.mrb[0].mxu0 %v687_v35  ;;  %6199 = vst [vmem:[#allocation27_spill] sm:$0xff] %v4406_v28  ;;  %v4419_v32 = vsub.f32 %v502_v13, %v502_v13  ;;  %vm287_vm8 = vcmp.eq.s32.totalorder %v4401_v6, %v4334_v27  ;;  %v4425_v11 = vpack.c.bf16 %v1200_v29, %v1193_v34  ;;  %v702_v33 = vand.u32 4294901760, %v4406_v28 }
  0x9d   : > { %6198 = vst [vmem:[#allocation26_spill] sm:$0xff] %v4387_v2  ;;  %v696_v48 = vand.u32 4294901760, %v4387_v2  ;;  %3587 = vmatpush1.bf16.msra.mxu0 %v3586_v12  ;;  %v683_v55 = vand.u32 4294901760, %v682_v8  ;;  %v3592_v12 = vpack.c.bf16 %v1198_v59, %v1191_v58  ;;  %vm284_vm9 = vcmp.eq.s32.totalorder %v4385_v9, %v4331_v22 }
  0x9e   : > { %3588 = vmatprep.subr.bf16.mxu0 %v6200_v4  ;;  %6201 = vst [vmem:[#allocation28_spill] sm:$0xff] %v4419_v32  ;;  %v688_v13 = vsub.f32 %v4368_v7, %v687_v35  ;;  %v1226_v8 = vand.u32 4294901760, %v4115_v44  ;;  %v4435_v5 = vsub.f32 %v3187_v45, %v3187_v45  ;;  %v6203_v29 = vmov 0.0  }
  0x9f   : > { %2072 = vmatprep.mubr.f32.mxu0 %v696_v48  ;;  %684 = vmatprep.mubr.f32.mxu1 %v683_v55  ;;  %v4438_v34 = vsel %vm287_vm8, 1.0, %v6203_v29  ;;  %v697_v58 = vsub.f32 %v4387_v2, %v696_v48  ;;  %v1206_v59 = vsub.f32 %v4097_v37, %v1205_v42  ;;  %v4443_v30 = vsub.f32 %v505_v46, %v505_v46 }
  0xa0   : > { %6202 = vst [vmem:[#allocation29_spill] sm:$0xff] %v4435_v5  ;;  %v689_v55 = vand.u32 4294901760, %v688_v13  ;;  %2076 = vmatmul.mubr.f32.gmra.mrb[2].mxu0 %v702_v33  ;;  %v711_v35 = vand.u32 4294901760, %v4419_v32  ;;  %v3189_v45 = vsel %vm284_vm9, 1.0, %v6203_v29  ;;  %vm289_vm10 = vcmp.eq.s32.totalorder %v4430_v52, %v4334_v27 }
  0xa1   : > { %3590 = vmatpush1.bf16.msra.mxu0 %v3589_v53  ;;  %6204 = vst [vmem:[#allocation30_spill] sm:$0xff] %v4443_v30  ;;  %v1213_v53 = vsub.f32 %v4100_v38, %v1212_v20  ;;  %v698_v48 = vand.u32 4294901760, %v697_v58  ;;  %v1220_v2 = vsub.f32 %v4112_v43, %v1219_v19  ;;  %vm286_vm11 = vcmp.eq.s32.totalorder %v4401_v6, %v4331_v22  ;;  %v4460_v38 = vpop.permute.xlu0 %201 }
  0xa2   : > { %3591 = vmatprep.subr.bf16.mxu0 %v6200_v4  ;;  %v508_v46 = vsel %vm494_vm0, %v4438_v34, 0  ;;  %690 = vmatmul.mubr.f32.vlgmr.msra.gmra.mrb[0].mxu1 %v689_v55  ;;  %v703_v13 = vsub.f32 %v4406_v28, %v702_v33  ;;  %v1227_v7 = vsub.f32 %v4115_v44, %v1226_v8  ;;  %v717_v58 = vand.u32 4294901760, %v4435_v5 }
  0xa3   : > { %2083 = vmatprep.mubr.f32.mxu0 %v711_v35  ;;  %3479 = vmatpush1.bf16.msra.mxu1 %v3478_v61  ;;  %v712_v43 = vsub.f32 %v4419_v32, %v711_v35  ;;  %v3595_v37 = vpack.c.bf16 %v1212_v20, %v1205_v42  ;;  %v1233_v9 = vand.u32 4294901760, %v4135_v50  ;;  %v4465_v23 = vsub.f32 %v3189_v45, %v3189_v45 }
  0xa4   : > { %699 = vmatprep.mubr.f32.mxu1 %v698_v48  ;;  %v4471_v33 = vsel %vm289_vm10, 1.0, %v6203_v29  ;;  %v704_v55 = vand.u32 4294901760, %v703_v13  ;;  %v726_v28 = vand.u32 4294901760, %v4443_v30  ;;  %3480 = vmatprep.subr.bf16.mxu1 %v6200_v4  ;;  %v3191_v42 = vsel %vm286_vm11, 1.0, %v6203_v29  ;;  %v6394_v40 = vld [vmem:[#allocation26_spill] sm:$0xff] }
  0xa5   : > { %6205 = vst [vmem:[#allocation31_spill] sm:$0xff] %v4465_v23  ;;  %3593 = vmatpush1.bf16.msra.mxu0 %v3592_v12  ;;  %v4479_v61 = vsub.f32 %v508_v46, %v508_v46  ;;  %v713_v20 = vand.u32 4294901760, %v712_v43  ;;  %v1207_v35 = vand.u32 4294901760, %v1206_v59  ;;  %vm291_vm12 = vcmp.eq.s32.totalorder %v4460_v38, %v4334_v27 }
  0xa6   : > { %2087 = vmatmul.mubr.f32.gmra.mrb[4].mxu0 %v717_v58  ;;  %3594 = vmatprep.subr.bf16.mxu0 %v6200_v4  ;;  %v1214_v45 = vand.u32 4294901760, %v1213_v53  ;;  %v1221_v48 = vand.u32 4294901760, %v1220_v2  ;;  %v1228_v12 = vand.u32 4294901760, %v1227_v7  ;;  %v511_v13 = vsel %vm494_vm0, %v4471_v33, 0 }
  0xa7   : > { %6206 = vst [vmem:[#allocation32_spill] sm:$0xff] %v4479_v61  ;;  %705 = vmatmul.mubr.f32.gmra.mrb[2].mxu1 %v704_v55  ;;  %2094 = vmatprep.mubr.f32.mxu0 %v726_v28  ;;  %v718_v46 = vsub.f32 %v4435_v5, %v717_v58  ;;  %v3598_v43 = vpack.c.bf16 %v1226_v8, %v1219_v19  ;;  %v1240_v32 = vand.u32 4294901760, %v4140_v51  ;;  %v4493_v55 = vpop.permute.xlu1 %204  ;;  %v732_v2 = vand.u32 4294901760, %v4465_v23  ;;  %v6397_v3 = vld [vmem:[#allocation29_spill] sm:$0xff] }
  0xa8   : > { %714 = vmatprep.mubr.f32.mxu1 %v713_v20  ;;  %3482 = vmatpush1.bf16.msra.mxu1 %v4411_v63  ;;  %vm288_vm13 = vcmp.eq.s32.totalorder %v4430_v52, %v4331_v22  ;;  %v4491_v59 = vsub.f32 %v3191_v42, %v3191_v42  ;;  %v4498_v7 = vsub.f32 %v4135_v50, %v1233_v9  ;;  %v4504_v63 = vsel %vm291_vm12, 1.0, %v6203_v29 }
  0xa9   : > { %3483 = vmatprep.subr.bf16.mxu1 %v6200_v4  ;;  %3596 = vmatpush1.bf16.msra.mxu0 %v3595_v37  ;;  %v719_v19 = vand.u32 4294901760, %v718_v46  ;;  %v727_v8 = vsub.f32 %v4443_v30, %v726_v28  ;;  %v741_v53 = vand.u32 4294901760, %v4479_v61  ;;  %v4509_v58 = vsub.f32 %v511_v13, %v511_v13 }
  0xaa   : > { %6207 = vst [vmem:[#allocation33_spill] sm:$0xff] %v4491_v59  ;;  %3597 = vmatprep.subr.bf16.mxu0 %v6200_v4  ;;  %2098 = vmatmul.mubr.f32.gmra.mrb[6].mxu0 %v732_v2  ;;  %v3487_v37 = vpack.c.bf16 %v1214_v45, %v1207_v35  ;;  %v4511_v42 = vpack.c.bf16 %v1228_v12, %v1221_v48  ;;  %v3193_v20 = vsel %vm288_vm13, 1.0, %v6203_v29  ;;  %v514_v35 = vsel %vm494_vm0, %v4504_v63, 0  ;;  %v4527_v12 = vpop.permute.xlu0 %207 }
  0xab   : > { %6208 = vst [vmem:[#allocation34_spill] sm:$0xff] %v4509_v58  ;;  %vm293_vm14 = vcmp.eq.s32.totalorder %v4493_v55, %v4334_v27  ;;  %720 = vmatmul.mubr.f32.gmra.mrb[4].mxu1 %v719_v19  ;;  %v728_v28 = vand.u32 4294901760, %v727_v8  ;;  %2105 = vmatprep.mubr.f32.mxu0 %v741_v53  ;;  %v1241_v46 = vsub.f32 %v4140_v51, %v1240_v32  ;;  %v1247_v45 = vand.u32 4294901760, %v4149_v54 }
  0xac   : > { %vm6163_vm15 = vcmp.eq.s32.totalorder %v4460_v38, %v4331_v22  ;;  %3485 = vmatpush1.bf16.msra.mxu1 %v4425_v11  ;;  %v1254_v48 = vand.u32 4294901760, %v4155_v56  ;;  %6209 = vst [vmem:[#allocation35_spill] sm:$0xff] %v4527_v12  ;;  %v733_v13 = vsub.f32 %v4465_v23, %v732_v2  ;;  %v747_v19 = vand.u32 4294901760, %v4491_v59 }
  0xad   : > { %3599 = vmatpush1.bf16.msra.mxu0 %v3598_v43  ;;  %729 = vmatprep.mubr.f32.mxu1 %v728_v28  ;;  %v1235_v8 = vand.u32 4294901760, %v4498_v7  ;;  %v3601_v30 = vpack.c.bf16 %v1240_v32, %v1233_v9  ;;  %v4533_v5 = vsub.f32 %v3193_v20, %v3193_v20  ;;  %v4539_v11 = vsel %vm293_vm14, 1.0, %v6203_v29 }
  0xae   : > { %3486 = vmatprep.subr.bf16.mxu1 %v6200_v4  ;;  %6211 = vst [vmem:[#allocation37_spill] sm:$0xff] %v4539_v11  ;;  %v742_v43 = vsub.f32 %v4479_v61, %v741_v53  ;;  %v756_v28 = vand.u32 4294901760, %v4509_v58  ;;  %3600 = vmatprep.subr.bf16.mxu0 %v6200_v4  ;;  %v3195_v2 = vsel %vm6163_vm15, 1.0, %v6203_v29  ;;  %v4548_v9 = vsub.f32 %v514_v35, %v514_v35  ;;  %v6400_v62 = vld [vmem:[#allocation32_spill] sm:$0xff] }
  0xaf   : > { %6210 = vst [vmem:[#allocation36_spill] sm:$0xff] %v4533_v5  ;;  %v734_v32 = vand.u32 4294901760, %v733_v13  ;;  %2109 = vmatmul.mubr.f32.gmra.mrb[8].mxu0 %v747_v19  ;;  %v1242_v7 = vand.u32 4294901760, %v1241_v46  ;;  %vm295_vm2 = vcmp.eq.s32.totalorder %v4527_v12, %v4334_v27  ;;  %v1248_v53 = vsub.f32 %v4149_v54, %v1247_v45 }
  0xb0   : > { %6212 = vst [vmem:[#allocation38_spill] sm:$0xff] %v4548_v9  ;;  %v743_v20 = vand.u32 4294901760, %v742_v43  ;;  %2116 = vmatprep.mubr.f32.mxu0 %v756_v28  ;;  %3488 = vmatpush1.bf16.msra.mxu1 %v3487_v37  ;;  %v1255_v61 = vsub.f32 %v4155_v56, %v1254_v48  ;;  %v517_v23 = vsel %vm494_vm0, %v4539_v11, 0  ;;  %v748_v35 = vsub.f32 %v4491_v59, %v747_v19  ;;  %v4563_v37 = vpop.permute.xlu1 %210 }
  0xb1   : > { %735 = vmatmul.mubr.f32.gmra.mrb[6].mxu1 %v734_v32  ;;  %3489 = vmatprep.subr.bf16.mxu1 %v6200_v4  ;;  %v3604_v13 = vpack.c.bf16 %v1254_v48, %v1247_v45  ;;  %v1261_v46 = vand.u32 4294901760, %v4160_v57  ;;  %vm6162_vm3 = vcmp.eq.s32.totalorder %v4493_v55, %v4331_v22  ;;  %v4561_v43 = vsub.f32 %v3195_v2, %v3195_v2 }
  0xb2   : > { %6214 = vst [vmem:[#allocation40_spill] sm:$0xff] %v4563_v37  ;;  %744 = vmatprep.mubr.f32.mxu1 %v743_v20  ;;  %v762_v56 = vand.u32 4294901760, %v4533_v5  ;;  %3602 = vmatpush1.bf16.msra.mxu0 %v3601_v30  ;;  %v1268_v32 = vand.u32 4294901760, %v4167_v60  ;;  %v4571_v45 = vsel %vm295_vm2, 1.0, %v6203_v29  ;;  %v749_v48 = vand.u32 4294901760, %v748_v35 }
  0xb3   : > { %6213 = vst [vmem:[#allocation39_spill] sm:$0xff] %v4561_v43  ;;  %v757_v19 = vsub.f32 %v4509_v58, %v756_v28  ;;  %v771_v2 = vand.u32 4294901760, %v4548_v9  ;;  %3603 = vmatprep.subr.bf16.mxu0 %v6200_v4  ;;  %v4576_v59 = vsub.f32 %v517_v23, %v517_v23  ;;  %v3493_v20 = vpack.c.bf16 %v1242_v7, %v1235_v8  ;;  %v4591_v7 = vpop.permute.xlu0 %213 }
  0xb4   : > { %2120 = vmatmul.mubr.f32.gmra.mrb[10].mxu0 %v762_v56  ;;  %v1249_v30 = vand.u32 4294901760, %v1248_v53  ;;  %v1256_v54 = vand.u32 4294901760, %v1255_v61  ;;  %v3197_v11 = vsel %vm6162_vm3, 1.0, %v6203_v29  ;;  %vm297_vm4 = vcmp.eq.s32.totalorder %v4563_v37, %v4334_v27  ;;  %3491 = vmatpush1.bf16.msra.mxu1 %v4511_v42  ;;  %6216 = vst [vmem:[#allocation42_spill] sm:$0xff] %v4591_v7 }
  0xb5   : > { %6215 = vst [vmem:[#allocation41_spill] sm:$0xff] %v4576_v59  ;;  %750 = vmatmul.mubr.f32.gmra.mrb[8].mxu1 %v749_v48  ;;  %v758_v28 = vand.u32 4294901760, %v757_v19  ;;  %2127 = vmatprep.mubr.f32.mxu0 %v771_v2  ;;  %v1262_v35 = vsub.f32 %v4160_v57, %v1261_v46  ;;  %vm6081_vm6 = vcmp.eq.s32.totalorder %v4527_v12, %v4331_v22  ;;  %v520_v23 = vsel %vm494_vm0, %v4571_v45, 0 }
  0xb6   : > { %3605 = vmatpush1.bf16.msra.mxu0 %v3604_v13  ;;  %v1269_v61 = vsub.f32 %v4167_v60, %v1268_v32  ;;  %v3607_v8 = vpack.c.bf16 %v1268_v32, %v1261_v46  ;;  %v763_v53 = vsub.f32 %v4533_v5, %v762_v56  ;;  %v777_v48 = vand.u32 4294901760, %v4561_v43  ;;  %3492 = vmatprep.subr.bf16.mxu1 %v6200_v4  ;;  %v6404_v6 = vld [vmem:[#allocation36_spill] sm:$0xff] }
  0xb7   : > { %759 = vmatprep.mubr.f32.mxu1 %v758_v28  ;;  %v1275_v19 = vand.u32 4294901760, %v4178_v0  ;;  %v1282_v58 = vand.u32 4294901760, %v4183_v1  ;;  %v4598_v57 = vsub.f32 %v3197_v11, %v3197_v11  ;;  %v4604_v42 = vsel %vm297_vm4, 1.0, %v6203_v29  ;;  %3606 = vmatprep.subr.bf16.mxu0 %v6200_v4 }
  0xb8   : > { %6218 = vst [vmem:[#allocation44_spill] sm:$0xff] %v4604_v42  ;;  %v772_v13 = vsub.f32 %v4548_v9, %v771_v2  ;;  %v786_v56 = vand.u32 4294901760, %v4576_v59  ;;  %v3199_v46 = vsel %vm6081_vm6, 1.0, %v6203_v29  ;;  %v4613_v32 = vsub.f32 %v520_v23, %v520_v23  ;;  %2131 = vmatmul.mubr.f32.gmra.mrb[12].mxu0 %v777_v48  ;;  %3494 = vmatpush1.bf16.msra.mxu1 %v3493_v20  ;;  %v4627_v20 = vpop.permute.xlu1 %216 }
  0xb9   : > { %6217 = vst [vmem:[#allocation43_spill] sm:$0xff] %v4598_v57  ;;  %v764_v11 = vand.u32 4294901760, %v763_v53  ;;  %v3496_v28 = vpack.c.bf16 %v1256_v54, %v1249_v30  ;;  %vm299_vm8 = vcmp.eq.s32.totalorder %v4591_v7, %v4334_v27  ;;  %v1263_v2 = vand.u32 4294901760, %v1262_v35  ;;  %3495 = vmatprep.subr.bf16.mxu1 %v6200_v4  ;;  %6221 = vst [vmem:[#allocation47_spill] sm:$0xff] %v4627_v20 }
  0xba   : > { %6219 = vst [vmem:[#allocation45_spill] sm:$0xff] %v4613_v32  ;;  %v773_v5 = vand.u32 4294901760, %v772_v13  ;;  %2138 = vmatprep.mubr.f32.mxu0 %v786_v56  ;;  %v1270_v9 = vand.u32 4294901760, %v1269_v61  ;;  %v523_v60 = vsel %vm494_vm0, %v4604_v42, 0  ;;  %v778_v12 = vsub.f32 %v4561_v43, %v777_v48  ;;  %3608 = vmatpush1.bf16.msra.mxu0 %v3607_v8  ;;  %v4651_v8 = vpop.permute.xlu0 %219  ;;  %v6407_v52 = vld [vmem:[#allocation39_spill] sm:$0xff] }
  0xbb   : > { %765 = vmatmul.mubr.f32.gmra.mrb[10].mxu1 %v764_v11  ;;  %v1276_v23 = vsub.f32 %v4178_v0, %v1275_v19  ;;  %v1283_v54 = vsub.f32 %v4183_v1, %v1282_v58  ;;  %vm6080_vm10 = vcmp.eq.s32.totalorder %v4563_v37, %v4331_v22  ;;  %v4625_v30 = vsub.f32 %v3199_v46, %v3199_v46 }
  0xbc   : > { %774 = vmatprep.mubr.f32.mxu1 %v773_v5  ;;  %v792_v35 = vand.u32 4294901760, %v4598_v57  ;;  %v3610_v61 = vpack.c.bf16 %v1282_v58, %v1275_v19  ;;  %v4634_v53 = vsel %vm299_vm8, 1.0, %v6203_v29  ;;  %v779_v48 = vand.u32 4294901760, %v778_v12  ;;  %3609 = vmatprep.subr.bf16.mxu0 %v6200_v4  ;;  %6224 = vst [vmem:[#allocation50_spill] sm:$0xff] %v4651_v8 }
  0xbd   : > { %6220 = vst [vmem:[#allocation46_spill] sm:$0xff] %v4625_v30  ;;  %6222 = vst [vmem:[#allocation48_spill] sm:$0xff] %v4634_v53  ;;  %v787_v13 = vsub.f32 %v4576_v59, %v786_v56  ;;  %v801_v11 = vand.u32 4294901760, %v4613_v32  ;;  %v4639_v46 = vsub.f32 %v523_v60, %v523_v60  ;;  %v3201_v5 = vsel %vm6080_vm10, 1.0, %v6203_v29  ;;  %3497 = vmatpush1.bf16.msra.mxu1 %v3496_v28 }
  0xbe   : > { %2142 = vmatmul.mubr.f32.gmra.mrb[14].mxu0 %v792_v35  ;;  %vm301_vm12 = vcmp.eq.s32.totalorder %v4627_v20, %v4334_v27  ;;  %vm6041_vm14 = vcmp.eq.s32.totalorder %v4591_v7, %v4331_v22  ;;  %v526_v12 = vsel %vm494_vm0, %v4634_v53, 0  ;;  %v3499_v60 = vpack.c.bf16 %v1270_v9, %v1263_v2  ;;  %3498 = vmatprep.subr.bf16.mxu1 %v6200_v4 }
  0xbf   : > { %6223 = vst [vmem:[#allocation49_spill] sm:$0xff] %v4639_v46  ;;  %780 = vmatmul.mubr.f32.gmra.mrb[12].mxu1 %v779_v48  ;;  %v788_v58 = vand.u32 4294901760, %v787_v13  ;;  %2149 = vmatprep.mubr.f32.mxu0 %v801_v11  ;;  %v793_v19 = vsub.f32 %v4598_v57, %v792_v35  ;;  %v807_v56 = vand.u32 4294901760, %v4625_v30  ;;  %v1277_v48 = vand.u32 4294901760, %v1276_v23 }
  0xc0   : > { %3611 = vmatpush1.bf16.msra.mxu0 %v3610_v61  ;;  %v1284_v13 = vand.u32 4294901760, %v1283_v54  ;;  %v4656_v59 = vsub.f32 %v3201_v5, %v3201_v5  ;;  %v4662_v28 = vsel %vm301_vm12, 1.0, %v6203_v29  ;;  %v802_v9 = vsub.f32 %v4613_v32, %v801_v11  ;;  %v4673_v61 = vpop.permute.xlu1 %222 }
  0xc1   : > { %789 = vmatprep.mubr.f32.mxu1 %v788_v58  ;;  %6226 = vst [vmem:[#allocation52_spill] sm:$0xff] %v4662_v28  ;;  %v816_v2 = vand.u32 4294901760, %v4639_v46  ;;  %3612 = vmatprep.subr.bf16.mxu0 %v6200_v4  ;;  %v3203_v23 = vsel %vm6041_vm14, 1.0, %v6203_v29  ;;  %v4671_v54 = vsub.f32 %v526_v12, %v526_v12  ;;  %v794_v35 = vand.u32 4294901760, %v793_v19  ;;  %6228 = vst [vmem:[#allocation54_spill] sm:$0xff] %v4673_v61 }
  0xc2   : > { %6225 = vst [vmem:[#allocation51_spill] sm:$0xff] %v4656_v59  ;;  %2153 = vmatmul.mubr.f32.gmra.mrb[16].mxu0 %v807_v56  ;;  %vm303_vm2 = vcmp.eq.s32.totalorder %v4651_v8, %v4334_v27  ;;  %v803_v5 = vand.u32 4294901760, %v802_v9  ;;  %3500 = vmatpush1.bf16.msra.mxu1 %v3499_v60  ;;  %v529_v11 = vsel %vm494_vm0, %v4662_v28, 0  ;;  %v808_v58 = vsub.f32 %v4625_v30, %v807_v56 }
  0xc3   : > { %6227 = vst [vmem:[#allocation53_spill] sm:$0xff] %v4671_v54  ;;  %2160 = vmatprep.mubr.f32.mxu0 %v816_v2  ;;  %795 = vmatmul.mubr.f32.gmra.mrb[14].mxu1 %v794_v35  ;;  %vm6040_vm4 = vcmp.eq.s32.totalorder %v4627_v20, %v4331_v22  ;;  %v4683_v12 = vsub.f32 %v3203_v23, %v3203_v23  ;;  %v822_v19 = vand.u32 4294901760, %v4656_v59  ;;  %v4687_v9 = vsel %vm303_vm2, 1.0, %v6203_v29 }
  0xc4   : > { %3501 = vmatprep.subr.bf16.mxu1 %v6200_v4  ;;  %804 = vmatprep.mubr.f32.mxu1 %v803_v5  ;;  %v3502_v32 = vpack.c.bf16 %v1284_v13, %v1277_v48  ;;  %6230 = vst [vmem:[#allocation56_spill] sm:$0xff] %v4687_v9  ;;  %v809_v60 = vand.u32 4294901760, %v808_v58  ;;  %v817_v57 = vsub.f32 %v4639_v46, %v816_v2  ;;  %v831_v35 = vand.u32 4294901760, %v4671_v54  ;;  %v4699_v48 = vpop.permute.xlu0 %225  ;;  %v4705_v5 = vpop.permute.xlu1 %228 }
  0xc5   : > { %6229 = vst [vmem:[#allocation55_spill] sm:$0xff] %v4683_v12  ;;  %v4691_v56 = vsub.f32 %v529_v11, %v529_v11  ;;  %v3205_v23 = vsel %vm6040_vm4, 1.0, %v6203_v29  ;;  %vm305_vm8 = vcmp.eq.s32.totalorder %v4673_v61, %v4334_v27  ;;  %6232 = vst [vmem:[#allocation58_spill] sm:$0xff] %v4699_v48  ;;  %vm6033_vm12 = vcmp.eq.s32.totalorder %v4651_v8, %v4331_v22 }
  0xc6   : > { %2164 = vmatmul.mubr.f32.gmra.mrb[18].mxu0 %v822_v19  ;;  %v818_v13 = vand.u32 4294901760, %v817_v57  ;;  %v532_v2 = vsel %vm494_vm0, %v4687_v9, 0  ;;  %6233 = vst [vmem:[#allocation59_spill] sm:$0xff] %v4705_v5  ;;  %3503 = vmatpush1.bf16.msra.mxu1 %v3502_v32  ;;  %v823_v11 = vsub.f32 %v4656_v59, %v822_v19  ;;  %v837_v58 = vand.u32 4294901760, %v4683_v12 }
  0xc7   : > { %6231 = vst [vmem:[#allocation57_spill] sm:$0xff] %v4691_v56  ;;  %810 = vmatmul.mubr.f32.gmra.mrb[16].mxu1 %v809_v60  ;;  %2171 = vmatprep.mubr.f32.mxu0 %v831_v35  ;;  %v4710_v46 = vsub.f32 %v3205_v23, %v3205_v23  ;;  %v4713_v57 = vsel %vm305_vm8, 1.0, %v6203_v29  ;;  %v832_v60 = vsub.f32 %v4671_v54, %v831_v35  ;;  %v846_v30 = vand.u32 4294901760, %v4691_v56 }
  0xc8   : > { %819 = vmatprep.mubr.f32.mxu1 %v818_v13  ;;  %3504 = vmatprep.subr.bf16.mxu1 %v6200_v4  ;;  %6235 = vst [vmem:[#allocation61_spill] sm:$0xff] %v4713_v57  ;;  %v3207_v32 = vsel %vm6033_vm12, 1.0, %v6203_v29  ;;  %v4721_v13 = vsub.f32 %v532_v2, %v532_v2  ;;  %vm309_vm2 = vcmp.eq.s32.totalorder %v4705_v5, %v4334_v27  ;;  %v824_v19 = vand.u32 4294901760, %v823_v11  ;;  %v4729_v54 = vpop.permute.xlu0 %231 }
  0xc9   : > { %6234 = vst [vmem:[#allocation60_spill] sm:$0xff] %v4710_v46  ;;  %vm307_vm8 = vcmp.eq.s32.totalorder %v4699_v48, %v4334_v27  ;;  %v833_v23 = vand.u32 4294901760, %v832_v60  ;;  %v535_v35 = vsel %vm494_vm0, %v4713_v57, 0  ;;  %6237 = vst [vmem:[#allocation63_spill] sm:$0xff] %v4729_v54  ;;  %v838_v59 = vsub.f32 %v4683_v12, %v837_v58  ;;  %v4743_v57 = vpop.permute.xlu1 %234 }
  0xca   : > { %6236 = vst [vmem:[#allocation62_spill] sm:$0xff] %v4721_v13  ;;  %2175 = vmatmul.mubr.f32.gmra.mrb[20].mxu0 %v837_v58  ;;  %vm6079_vm12 = vcmp.eq.s32.totalorder %v4673_v61, %v4331_v22  ;;  %v4734_v2 = vsub.f32 %v3207_v32, %v3207_v32  ;;  %v4737_v11 = vsel %vm309_vm2, 1.0, %v6203_v29  ;;  %v852_v60 = vand.u32 4294901760, %v4710_v46  ;;  %6241 = vst [vmem:[#allocation67_spill] sm:$0xff] %v4743_v57 }
  0xcb   : > { %2182 = vmatprep.mubr.f32.mxu0 %v846_v30  ;;  %825 = vmatmul.mubr.f32.gmra.mrb[18].mxu1 %v824_v19  ;;  %6239 = vst [vmem:[#allocation65_spill] sm:$0xff] %v4737_v11  ;;  %v4741_v43 = vsel %vm307_vm8, 1.0, %v6203_v29  ;;  %v839_v8 = vand.u32 4294901760, %v838_v59  ;;  %v847_v19 = vsub.f32 %v4691_v56, %v846_v30  ;;  %v861_v58 = vand.u32 4294901760, %v4721_v13 }
  0xcc   : > { %6238 = vst [vmem:[#allocation64_spill] sm:$0xff] %v4734_v2  ;;  %834 = vmatprep.mubr.f32.mxu1 %v833_v23  ;;  %6240 = vst [vmem:[#allocation66_spill] sm:$0xff] %v4741_v43  ;;  %v4747_v12 = vsub.f32 %v535_v35, %v535_v35  ;;  %vm6078_vm4 = vcmp.eq.s32.totalorder %v4699_v48, %v4331_v22  ;;  %vm311_vm2 = vcmp.eq.s32.totalorder %v4729_v54, %v4334_v27  ;;  %v4780_v61 = vpop.permute.xlu0 %237 }
  0xcd   : > { %v3209_v32 = vsel %vm6079_vm12, 1.0, %v6203_v29  ;;  %vm6061_vm8 = vcmp.eq.s32.totalorder %v4705_v5, %v4331_v22  ;;  %v848_v59 = vand.u32 4294901760, %v847_v19  ;;  %v541_v30 = vsel %vm494_vm0, %v4737_v11, 0  ;;  %6245 = vst [vmem:[#allocation71_spill] sm:$0xff] %v4780_v61 }
  0xce   : > { %6242 = vst [vmem:[#allocation68_spill] sm:$0xff] %v4747_v12  ;;  %2186 = vmatmul.mubr.f32.gmra.mrb[22].mxu0 %v852_v60  ;;  %v538_v23 = vsel %vm494_vm0, %v4741_v43, 0  ;;  %vm313_vm14 = vcmp.eq.s32.totalorder %v4743_v57, %v4334_v27  ;;  %v3211_v35 = vsel %vm6078_vm4, 1.0, %v6203_v29  ;;  %v4770_v56 = vsel %vm311_vm2, 1.0, %v6203_v29 }
  0xcf   : > { %840 = vmatmul.mubr.f32.gmra.mrb[20].mxu1 %v839_v8  ;;  %2193 = vmatprep.mubr.f32.mxu0 %v861_v58  ;;  %6243 = vst [vmem:[#allocation69_spill] sm:$0xff] %v4770_v56  ;;  %v853_v8 = vsub.f32 %v4710_v46, %v852_v60  ;;  %v867_v19 = vand.u32 4294901760, %v4734_v2  ;;  %v4774_v11 = vsub.f32 %v3209_v32, %v3209_v32  ;;  %v3213_v43 = vsel %vm6061_vm8, 1.0, %v6203_v29  ;;  %v4791_v60 = vpop.permute.xlu1 %240 }
  0xd0   : > { %849 = vmatprep.mubr.f32.mxu1 %v848_v59  ;;  %v862_v48 = vsub.f32 %v4721_v13, %v861_v58  ;;  %v876_v9 = vand.u32 4294901760, %v4747_v12  ;;  %v4784_v20 = vsub.f32 %v538_v23, %v538_v23  ;;  %v4787_v59 = vsel %vm313_vm14, 1.0, %v6203_v29  ;;  %6248 = vst [vmem:[#allocation74_spill] sm:$0xff] %v4791_v60 }
  0xd1   : > { %6244 = vst [vmem:[#allocation70_spill] sm:$0xff] %v4774_v11  ;;  %6247 = vst [vmem:[#allocation73_spill] sm:$0xff] %v4787_v59  ;;  %vm6072_vm2 = vcmp.eq.s32.totalorder %v4729_v54, %v4331_v22  ;;  %v854_v32 = vand.u32 4294901760, %v853_v8  ;;  %v4793_v46 = vsub.f32 %v541_v30, %v541_v30  ;;  %v4795_v5 = vsub.f32 %v3211_v35, %v3211_v35 }
  0xd2   : > { %6246 = vst [vmem:[#allocation72_spill] sm:$0xff] %v4784_v20  ;;  %2197 = vmatmul.mubr.f32.gmra.mrb[24].mxu0 %v867_v19  ;;  %v544_v58 = vsel %vm494_vm0, %v4770_v56, 0  ;;  %v863_v13 = vand.u32 4294901760, %v862_v48  ;;  %v4799_v23 = vsub.f32 %v3213_v43, %v3213_v43  ;;  %vm315_vm14 = vcmp.eq.s32.totalorder %v4780_v61, %v4334_v27 }
  0xd3   : > { %6249 = vst [vmem:[#allocation75_spill] sm:$0xff] %v4793_v46  ;;  %6250 = vst [vmem:[#allocation76_spill] sm:$0xff] %v4795_v5  ;;  %2204 = vmatprep.mubr.f32.mxu0 %v876_v9  ;;  %855 = vmatmul.mubr.f32.gmra.mrb[22].mxu1 %v854_v32  ;;  %v868_v28 = vsub.f32 %v4734_v2, %v867_v19  ;;  %vm6074_vm8 = vcmp.eq.s32.totalorder %v4743_v57, %v4331_v22  ;;  %v547_v30 = vsel %vm494_vm0, %v4787_v59, 0 }
  0xd4   : > { %6251 = vst [vmem:[#allocation77_spill] sm:$0xff] %v4799_v23  ;;  %v3215_v43 = vsel %vm6072_vm2, 1.0, %v6203_v29  ;;  %864 = vmatprep.mubr.f32.mxu1 %v863_v13  ;;  %v882_v48 = vand.u32 4294901760, %v4774_v11  ;;  %v4814_v35 = vsub.f32 %v544_v58, %v544_v58  ;;  %v877_v19 = vsub.f32 %v4747_v12, %v876_v9 }
  0xd5   : > { %v869_v32 = vand.u32 4294901760, %v868_v28  ;;  %v891_v8 = vand.u32 4294901760, %v4784_v20  ;;  %v4819_v2 = vsel %vm315_vm14, 1.0, %v6203_v29  ;;  %v897_v56 = vand.u32 4294901760, %v4795_v5  ;;  %v4828_v28 = vpop.permute.xlu1 %246 }
  0xd6   : > { %6252 = vst [vmem:[#allocation78_spill] sm:$0xff] %v4814_v35  ;;  %6253 = vst [vmem:[#allocation79_spill] sm:$0xff] %v4819_v2  ;;  %2208 = vmatmul.mubr.f32.gmra.mrb[26].mxu0 %v882_v48  ;;  %v883_v59 = vsub.f32 %v4774_v11, %v882_v48  ;;  %v906_v54 = vand.u32 4294901760, %v4793_v46  ;;  %v3217_v13 = vsel %vm6074_vm8, 1.0, %v6203_v29  ;;  %v878_v9 = vand.u32 4294901760, %v877_v19  ;;  %v4840_v11 = vpop.permute.xlu0 %243 }
  0xd7   : > { %6254 = vst [vmem:[#allocation80_spill] sm:$0xff] %v4828_v28  ;;  %870 = vmatmul.mubr.f32.gmra.mrb[24].mxu1 %v869_v32  ;;  %2215 = vmatprep.mubr.f32.mxu0 %v891_v8  ;;  %v892_v58 = vsub.f32 %v4784_v20, %v891_v8  ;;  %v4832_v7 = vsub.f32 %v547_v30, %v547_v30  ;;  %6257 = vst [vmem:[#allocation83_spill] sm:$0xff] %v4840_v11  ;;  %v550_v32 = vsel %vm494_vm0, %v4819_v2, 0 }
  0xd8   : > { %v4834_v48 = vsub.f32 %v3215_v43, %v3215_v43  ;;  %vm317_vm14 = vcmp.eq.s32.totalorder %v4791_v60, %v4334_v27  ;;  %vm314_vm2 = vcmp.eq.s32.totalorder %v4780_v61, %v4331_v22  ;;  %879 = vmatprep.mubr.f32.mxu1 %v878_v9  ;;  %v884_v19 = vand.u32 4294901760, %v883_v59 }
  0xd9   : > { %6255 = vst [vmem:[#allocation81_spill] sm:$0xff] %v4832_v7  ;;  %v898_v8 = vsub.f32 %v4795_v5, %v897_v56  ;;  %v912_v30 = vand.u32 4294901760, %v4799_v23  ;;  %vm321_vm8 = vcmp.eq.s32.totalorder %v4828_v28, %v4334_v27  ;;  %v893_v43 = vand.u32 4294901760, %v892_v58 }
  0xda   : > { %6256 = vst [vmem:[#allocation82_spill] sm:$0xff] %v4834_v48  ;;  %2219 = vmatmul.mubr.f32.gmra.mrb[28].mxu0 %v897_v56  ;;  %v907_v12 = vsub.f32 %v4793_v46, %v906_v54  ;;  %v921_v20 = vand.u32 4294901760, %v4814_v35  ;;  %v4850_v57 = vsub.f32 %v3217_v13, %v3217_v13  ;;  %vm316_vm4 = vcmp.eq.s32.totalorder %v4791_v60, %v4331_v22 }
  0xdb   : > { %v4855_v59 = vsel %vm317_vm14, 1.0, %v6203_v29  ;;  %vm319_vm12 = vcmp.eq.s32.totalorder %v4840_v11, %v4334_v27  ;;  %885 = vmatmul.mubr.f32.gmra.mrb[26].mxu1 %v884_v19  ;;  %2226 = vmatprep.mubr.f32.mxu0 %v906_v54  ;;  %v3219_v56 = vsel %vm314_vm2, 1.0, %v6203_v29  ;;  %v4863_v9 = vsub.f32 %v550_v32, %v550_v32 }
  0xdc   : > { %6258 = vst [vmem:[#allocation84_spill] sm:$0xff] %v4850_v57  ;;  %6259 = vst [vmem:[#allocation85_spill] sm:$0xff] %v4855_v59  ;;  %vm6109_vm10 = vcmp.eq.s32.totalorder %v4828_v28, %v4331_v22  ;;  %vm6110_vm6 = vcmp.eq.s32.totalorder %v4840_v11, %v4331_v22  ;;  %894 = vmatprep.mubr.f32.mxu1 %v893_v43  ;;  %v4873_v13 = vsel %vm321_vm8, 1.0, %v6203_v29  ;;  %v899_v54 = vand.u32 4294901760, %v898_v8 }
  0xdd   : > { %6260 = vst [vmem:[#allocation86_spill] sm:$0xff] %v4863_v9  ;;  %6261 = vst [vmem:[#allocation87_spill] sm:$0xff] %v4873_v13  ;;  %v913_v58 = vsub.f32 %v4799_v23, %v912_v30  ;;  %v927_v19 = vand.u32 4294901760, %v4834_v48  ;;  %v4878_v32 = vsel %vm319_vm12, 1.0, %v6203_v29  ;;  %v908_v46 = vand.u32 4294901760, %v907_v12  ;;  %v4888_v23 = vpop.permute.xlu0 %249 }
  0xde   : > { %6262 = vst [vmem:[#allocation88_spill] sm:$0xff] %v4878_v32  ;;  %2230 = vmatmul.mubr.f32.gmra.mrb[30].mxu0 %v912_v30  ;;  %v922_v5 = vsub.f32 %v4814_v35, %v921_v20  ;;  %v936_v43 = vand.u32 4294901760, %v4832_v7  ;;  %v3221_v61 = vsel %vm316_vm4, 1.0, %v6203_v29  ;;  %v553_v8 = vsel %vm494_vm0, %v4855_v59, 0  ;;  %6263 = vst [vmem:[#allocation89_spill] sm:$0xff] %v4888_v23 }
  0xdf   : > { %900 = vmatmul.mubr.f32.gmra.mrb[28].mxu1 %v899_v54  ;;  %2237 = vmatprep.mubr.f32.mxu0 %v921_v20  ;;  %v6264_v2 = vand.u32 4294901760, %v4225_v14  ;;  %v6265_v30 = vand.u32 4294901760, %v4239_v31  ;;  %v4896_v53 = vsub.f32 %v3219_v56, %v3219_v56  ;;  %v3225_v60 = vsel %vm6109_vm10, 1.0, %v6203_v29  ;;  %v4910_v54 = vpop.permute.xlu1 %252 }
  0xe0   : > { %v559_v59 = vsel %vm494_vm0, %v4873_v13, 0  ;;  %v3223_v20 = vsel %vm6110_vm6, 1.0, %v6203_v29  ;;  %909 = vmatprep.mubr.f32.mxu1 %v908_v46  ;;  %6267 = vst [vmem:[#allocation91_spill] sm:$0xff] %v4910_v54  ;;  %v914_v56 = vand.u32 4294901760, %v913_v58  ;;  %v942_v28 = vand.u32 4294901760, %v4850_v57 }
  0xe1   : > { %v1290_v12 = vsub.f32 %v4225_v14, %v6264_v2  ;;  %v1297_v35 = vsub.f32 %v4239_v31, %v6265_v30  ;;  %6266 = vst [vmem:[#allocation90_spill] sm:$0xff] %v4896_v53  ;;  %v556_v2 = vsel %vm494_vm0, %v4878_v32, 0  ;;  %v928_v30 = vsub.f32 %v4834_v48, %v927_v19 }
  0xe2   : > { %v4914_v37 = vsub.f32 %v553_v8, %v553_v8  ;;  %2241 = vmatmul.mubr.f32.gmra.mrb[32].mxu0 %v927_v19  ;;  %v923_v13 = vand.u32 4294901760, %v922_v5  ;;  %v937_v1 = vsub.f32 %v4832_v7, %v936_v43  ;;  %v951_v11 = vand.u32 4294901760, %v4863_v9 }
  0xe3   : > { %v4918_v0 = vsub.f32 %v3221_v61, %v3221_v61  ;;  %v4920_v46 = vsub.f32 %v3225_v60, %v3225_v60  ;;  %v4922_v32 = vsub.f32 %v3223_v20, %v3223_v20  ;;  %915 = vmatmul.mubr.f32.gmra.mrb[30].mxu1 %v914_v56  ;;  %2248 = vmatprep.mubr.f32.mxu0 %v936_v43  ;;  %v4934_v61 = vpop.permute.xlu0 %255  ;;  %v929_v5 = vand.u32 4294901760, %v928_v30 }
  0xe4   : > { %6268 = vst [vmem:[#allocation92_spill] sm:$0xff] %v4914_v37  ;;  %v4924_v58 = vsub.f32 %v559_v59, %v559_v59  ;;  %v4926_v48 = vsub.f32 %v556_v2, %v556_v2  ;;  %vm6128_vm12 = vcmp.eq.s32.totalorder %v4910_v54, %v4331_v22  ;;  %vm325_vm8 = vcmp.eq.s32.totalorder %v4910_v54, %v4334_v27 }
  0xe5   : > { %6269 = vst [vmem:[#allocation93_spill] sm:$0xff] %v4918_v0  ;;  %6270 = vst [vmem:[#allocation94_spill] sm:$0xff] %v4920_v46  ;;  %924 = vmatprep.mubr.f32.mxu1 %v923_v13  ;;  %vm323_vm14 = vcmp.eq.s32.totalorder %v4888_v23, %v4334_v27  ;;  %v943_v60 = vsub.f32 %v4850_v57, %v942_v28  ;;  %v957_v59 = vand.u32 4294901760, %v4896_v53  ;;  %v938_v19 = vand.u32 4294901760, %v937_v1 }
  0xe6   : > { %6271 = vst [vmem:[#allocation95_spill] sm:$0xff] %v4922_v32  ;;  %6272 = vst [vmem:[#allocation96_spill] sm:$0xff] %v4924_v58  ;;  %2252 = vmatmul.mubr.f32.gmra.mrb[34].mxu0 %v942_v28  ;;  %v952_v43 = vsub.f32 %v4863_v9, %v951_v11  ;;  %v966_v8 = vand.u32 4294901760, %v4914_v37  ;;  %v1291_v20 = vand.u32 4294901760, %v1290_v12  ;;  %v3229_v13 = vsel %vm6128_vm12, 1.0, %v6203_v29 }
  0xe7   : > { %6273 = vst [vmem:[#allocation97_spill] sm:$0xff] %v4926_v48  ;;  %6274 = vst [vmem:[#allocation98_spill] sm:$0xff] %v4934_v61  ;;  %v4945_v2 = vsel %vm325_vm8, 1.0, %v6203_v29  ;;  %vm322_vm10 = vcmp.eq.s32.totalorder %v4888_v23, %v4331_v22  ;;  %930 = vmatmul.mubr.f32.gmra.mrb[32].mxu1 %v929_v5  ;;  %2259 = vmatprep.mubr.f32.mxu0 %v951_v11  ;;  %v1298_v28 = vand.u32 4294901760, %v1297_v35  ;;  %v4953_v1 = vsel %vm323_vm14, 1.0, %v6203_v29 }
  0xe8   : > { %6275 = vst [vmem:[#allocation99_spill] sm:$0xff] %v4945_v2  ;;  %6276 = vst [vmem:[#allocation100_spill] sm:$0xff] %v4953_v1  ;;  %vm327_vm6 = vcmp.eq.s32.totalorder %v4934_v61, %v4334_v27  ;;  %939 = vmatprep.mubr.f32.mxu1 %v938_v19  ;;  %v972_v12 = vand.u32 4294901760, %v4918_v0  ;;  %v981_v56 = vand.u32 4294901760, %v4926_v48  ;;  %v944_v30 = vand.u32 4294901760, %v943_v60 }
  0xe9   : > { %v958_v9 = vsub.f32 %v4896_v53, %v957_v59  ;;  %v3505_v5 = vpack.c.bf16 %v1298_v28, %v1291_v20  ;;  %v6277_v11 = vand.u32 4294901760, %v4225_v14  ;;  %v6278_v35 = vand.u32 4294901760, %v4239_v31 }
  0xea   : > { %v565_v7 = vsel %vm494_vm0, %v4945_v2, 0  ;;  %v4966_v54 = vsub.f32 %v3229_v13, %v3229_v13  ;;  %2263 = vmatmul.mubr.f32.gmra.mrb[36].mxu0 %v957_v59  ;;  %v953_v19 = vand.u32 4294901760, %v952_v43  ;;  %v967_v42 = vsub.f32 %v4914_v37, %v966_v8  ;;  %v4977_v13 = vpop.permute.xlu1 %258 }
  0xeb   : > { %v3613_v57 = vpack.c.bf16 %v6278_v35, %v6277_v11  ;;  %v3227_v60 = vsel %vm322_vm10, 1.0, %v6203_v29  ;;  %v562_v20 = vsel %vm494_vm0, %v4953_v1, 0  ;;  %945 = vmatmul.mubr.f32.gmra.mrb[34].mxu1 %v944_v30  ;;  %2270 = vmatprep.mubr.f32.mxu0 %v966_v8  ;;  %v1303_v28 = vand.u32 4294901760, %v4246_v36  ;;  %v4988_v8 = vpop.permute.xlu0 %261 }
  0xec   : > { %6279 = vst [vmem:[#allocation101_spill] sm:$0xff] %v4966_v54  ;;  %v1310_v11 = vand.u32 4294901760, %v4249_v24  ;;  %v4983_v59 = vsel %vm327_vm6, 1.0, %v6203_v29  ;;  %954 = vmatprep.mubr.f32.mxu1 %v953_v19  ;;  %v973_v43 = vsub.f32 %v4918_v0, %v972_v12  ;;  %v987_v35 = vand.u32 4294901760, %v4922_v32  ;;  %3506 = vmatpush1.bf16.msra.mxu1 %v3505_v5 }
  0xed   : > { %v982_v30 = vsub.f32 %v4926_v48, %v981_v56  ;;  %v959_v37 = vand.u32 4294901760, %v958_v9  ;;  %3614 = vmatpush1.bf16.msra.mxu0 %v3613_v57  ;;  %3507 = vmatprep.subr.bf16.mxu1 %v6200_v4  ;;  %v1304_v53 = vsub.f32 %v4246_v36, %v1303_v28  ;;  %v4993_v1 = vsub.f32 %v565_v7, %v565_v7 }
  0xee   : > { %v1311_v2 = vsub.f32 %v4249_v24, %v1310_v11  ;;  %v3616_v23 = vpack.c.bf16 %v1310_v11, %v1303_v28  ;;  %v4995_v19 = vsub.f32 %v562_v20, %v562_v20  ;;  %2274 = vmatmul.mubr.f32.gmra.mrb[38].mxu0 %v972_v12  ;;  %v968_v0 = vand.u32 4294901760, %v967_v42  ;;  %3615 = vmatprep.subr.bf16.mxu0 %v6200_v4 }
  0xef   : > { %6280 = vst [vmem:[#allocation102_spill] sm:$0xff] %v4993_v1  ;;  %v996_v48 = vand.u32 4294901760, %v4924_v58  ;;  %v4999_v5 = vsub.f32 %v3227_v60, %v3227_v60  ;;  %vm329_vm6 = vcmp.eq.s32.totalorder %v4977_v13, %v4334_v27  ;;  %960 = vmatmul.mubr.f32.gmra.mrb[36].mxu1 %v959_v37  ;;  %2281 = vmatprep.mubr.f32.mxu0 %v981_v56  ;;  %v1305_v57 = vand.u32 4294901760, %v1304_v53 }
  0xf0   : > { %6281 = vst [vmem:[#allocation103_spill] sm:$0xff] %v4995_v19  ;;  %v1312_v9 = vand.u32 4294901760, %v1311_v2  ;;  %vm6135_vm8 = vcmp.eq.s32.totalorder %v4934_v61, %v4331_v22  ;;  %v568_v7 = vsel %vm494_vm0, %v4983_v59, 0  ;;  %vm331_vm14 = vcmp.eq.s32.totalorder %v4988_v8, %v4334_v27  ;;  %969 = vmatprep.mubr.f32.mxu1 %v968_v0 }
  0xf1   : > { %6282 = vst [vmem:[#allocation104_spill] sm:$0xff] %v4999_v5  ;;  %v988_v42 = vsub.f32 %v4922_v32, %v987_v35  ;;  %v974_v12 = vand.u32 4294901760, %v973_v43  ;;  %v983_v60 = vand.u32 4294901760, %v982_v30  ;;  %v1002_v20 = vand.u32 4294901760, %v4920_v46  ;;  %3617 = vmatpush1.bf16.msra.mxu0 %v3616_v23 }
  0xf2   : > { %v3508_v37 = vpack.c.bf16 %v1312_v9, %v1305_v57  ;;  %2285 = vmatmul.mubr.f32.gmra.mrb[40].mxu0 %v987_v35  ;;  %v997_v53 = vsub.f32 %v4924_v58, %v996_v48  ;;  %v1011_v2 = vand.u32 4294901760, %v4995_v19  ;;  %3618 = vmatprep.subr.bf16.mxu0 %v6200_v4  ;;  %v1317_v56 = vand.u32 4294901760, %v4252_v25  ;;  %v5038_v9 = vpop.permute.xlu1 %264 }
  0xf3   : > { %v1324_v28 = vand.u32 4294901760, %v4255_v39  ;;  %vm6134_vm12 = vcmp.eq.s32.totalorder %v4977_v13, %v4331_v22  ;;  %v5022_v0 = vsel %vm329_vm6, 1.0, %v6203_v29  ;;  %v3231_v23 = vsel %vm6135_vm8, 1.0, %v6203_v29  ;;  %975 = vmatmul.mubr.f32.gmra.mrb[38].mxu1 %v974_v12  ;;  %2292 = vmatprep.mubr.f32.mxu0 %v996_v48  ;;  %6284 = vst [vmem:[#allocation106_spill] sm:$0xff] %v5038_v9 }
  0xf4   : > { %v5028_v11 = vsub.f32 %v568_v7, %v568_v7  ;;  %v5034_v43 = vsel %vm331_vm14, 1.0, %v6203_v29  ;;  %984 = vmatprep.mubr.f32.mxu1 %v983_v60  ;;  %3509 = vmatpush1.bf16.msra.mxu1 %v3508_v37  ;;  %v1318_v35 = vsub.f32 %v4252_v25, %v1317_v56  ;;  %v989_v58 = vand.u32 4294901760, %v988_v42 }
  0xf5   : > { %v1325_v30 = vsub.f32 %v4255_v39, %v1324_v28  ;;  %v3619_v57 = vpack.c.bf16 %v1324_v28, %v1317_v56  ;;  %v1003_v7 = vsub.f32 %v4920_v46, %v1002_v20  ;;  %v1017_v48 = vand.u32 4294901760, %v4999_v5  ;;  %3510 = vmatprep.subr.bf16.mxu1 %v6200_v4 }
  0xf6   : > { %6283 = vst [vmem:[#allocation105_spill] sm:$0xff] %v5028_v11  ;;  %v1026_v12 = vand.u32 4294901760, %v4993_v1  ;;  %2296 = vmatmul.mubr.f32.gmra.mrb[42].mxu0 %v1002_v20  ;;  %v998_v32 = vand.u32 4294901760, %v997_v53  ;;  %v1012_v60 = vsub.f32 %v4995_v19, %v1011_v2  ;;  %v1319_v37 = vand.u32 4294901760, %v1318_v35 }
  0xf7   : > { %v1326_v61 = vand.u32 4294901760, %v1325_v30  ;;  %v571_v56 = vsel %vm494_vm0, %v5022_v0, 0  ;;  %v5047_v28 = vsub.f32 %v3231_v23, %v3231_v23  ;;  %990 = vmatmul.mubr.f32.gmra.mrb[40].mxu1 %v989_v58  ;;  %2303 = vmatprep.mubr.f32.mxu0 %v1011_v2  ;;  %v3233_v42 = vsel %vm6134_vm12, 1.0, %v6203_v29  ;;  %v5064_v30 = vpop.permute.xlu0 %267 }
  0xf8   : > { %vm333_vm6 = vcmp.eq.s32.totalorder %v5038_v9, %v4334_v27  ;;  %vm6137_vm14 = vcmp.eq.s32.totalorder %v4988_v8, %v4331_v22  ;;  %999 = vmatprep.mubr.f32.mxu1 %v998_v32  ;;  %3620 = vmatpush1.bf16.msra.mxu0 %v3619_v57  ;;  %v574_v53 = vsel %vm494_vm0, %v5034_v43, 0  ;;  %v1004_v23 = vand.u32 4294901760, %v1003_v7  ;;  %6287 = vst [vmem:[#allocation109_spill] sm:$0xff] %v5064_v30  ;;  %v5070_v7 = vpop.permute.xlu1 %270 }
  0xf9   : > { %6285 = vst [vmem:[#allocation107_spill] sm:$0xff] %v5047_v28  ;;  %v3511_v20 = vpack.c.bf16 %v1326_v61, %v1319_v37  ;;  %v1018_v58 = vsub.f32 %v4999_v5, %v1017_v48  ;;  %v1032_v2 = vand.u32 4294901760, %v4966_v54  ;;  %3621 = vmatprep.subr.bf16.mxu0 %v6200_v4  ;;  %v5062_v35 = vsub.f32 %v571_v56, %v571_v56 }
  0xfa   : > { %2307 = vmatmul.mubr.f32.gmra.mrb[44].mxu0 %v1017_v48  ;;  %v1013_v19 = vand.u32 4294901760, %v1012_v60  ;;  %v1027_v32 = vsub.f32 %v4993_v1, %v1026_v12  ;;  %v1041_v61 = vand.u32 4294901760, %v5028_v11  ;;  %v5068_v57 = vsub.f32 %v3233_v42, %v3233_v42 }
  0xfb   : > { %6286 = vst [vmem:[#allocation108_spill] sm:$0xff] %v5062_v35  ;;  %3512 = vmatpush1.bf16.msra.mxu1 %v3511_v20  ;;  %2314 = vmatprep.mubr.f32.mxu0 %v1026_v12  ;;  %vm6152_vm12 = vcmp.eq.s32.totalorder %v5038_v9, %v4331_v22  ;;  %v5078_v48 = vsel %vm333_vm6, 1.0, %v6203_v29  ;;  %v3235_v60 = vsel %vm6137_vm14, 1.0, %v6203_v29  ;;  %v5084_v37 = vsub.f32 %v574_v53, %v574_v53  ;;  %v5115_v5 = vpop.permute.xlu0 %273 }
  0xfc   : > { %6288 = vst [vmem:[#allocation110_spill] sm:$0xff] %v5068_v57  ;;  %1005 = vmatmul.mubr.f32.gmra.mrb[42].mxu1 %v1004_v23  ;;  %3513 = vmatprep.subr.bf16.mxu1 %v6200_v4  ;;  %vm335_vm8 = vcmp.eq.s32.totalorder %v5064_v30, %v4334_v27  ;;  %v1019_v12 = vand.u32 4294901760, %v1018_v58  ;;  %v1033_v56 = vsub.f32 %v4966_v54, %v1032_v2  ;;  %v1047_v42 = vand.u32 4294901760, %v5047_v28 }
  0xfd   : > { %6289 = vst [vmem:[#allocation111_spill] sm:$0xff] %v5084_v37  ;;  %1014 = vmatprep.mubr.f32.mxu1 %v1013_v19  ;;  %vm337_vm6 = vcmp.eq.s32.totalorder %v5070_v7, %v4334_v27  ;;  %v1028_v20 = vand.u32 4294901760, %v1027_v32  ;;  %v1042_v23 = vsub.f32 %v5028_v11, %v1041_v61  ;;  %v1056_v53 = vand.u32 4294901760, %v5062_v35  ;;  %6293 = vst [vmem:[#allocation115_spill] sm:$0xff] %v5115_v5 }
  0xfe   : > { %2318 = vmatmul.mubr.f32.gmra.mrb[46].mxu0 %v1032_v2  ;;  %v577_v19 = vsel %vm494_vm0, %v5078_v48, 0  ;;  %v3237_v58 = vsel %vm6152_vm12, 1.0, %v6203_v29  ;;  %v5101_v54 = vsub.f32 %v3235_v60, %v3235_v60  ;;  %vm6151_vm14 = vcmp.eq.s32.totalorder %v5064_v30, %v4331_v22 }
  0xff   : > { %2325 = vmatprep.mubr.f32.mxu0 %v1041_v61  ;;  %v5106_v2 = vsel %vm335_vm8, 1.0, %v6203_v29  ;;  %v5109_v32 = vsel %vm337_vm6, 1.0, %v6203_v29  ;;  %v1034_v11 = vand.u32 4294901760, %v1033_v56  ;;  %v1048_v61 = vsub.f32 %v5047_v28, %v1047_v42 }
 0x100   : > { %1020 = vmatmul.mubr.f32.gmra.mrb[44].mxu1 %v1019_v12  ;;  %6290 = vst [vmem:[#allocation112_spill] sm:$0xff] %v5101_v54  ;;  %6291 = vst [vmem:[#allocation113_spill] sm:$0xff] %v5109_v32  ;;  %v1062_v12 = vand.u32 4294901760, %v5068_v57  ;;  %v5113_v1 = vsub.f32 %v577_v19, %v577_v19  ;;  %v1043_v60 = vand.u32 4294901760, %v1042_v23  ;;  %v1057_v46 = vsub.f32 %v5062_v35, %v1056_v53  ;;  %v5137_v35 = vpop.permute.xlu1 %276 }
 0x101   : > { %1029 = vmatprep.mubr.f32.mxu1 %v1028_v20  ;;  %v1071_v9 = vand.u32 4294901760, %v5084_v37  ;;  %v580_v20 = vsel %vm494_vm0, %v5106_v2, 0  ;;  %v5121_v56 = vsub.f32 %v3237_v58, %v3237_v58  ;;  %vm336_vm8 = vcmp.eq.s32.totalorder %v5070_v7, %v4331_v22  ;;  %6296 = vst [vmem:[#allocation118_spill] sm:$0xff] %v5137_v35 }
 0x102   : > { %6292 = vst [vmem:[#allocation114_spill] sm:$0xff] %v5113_v1  ;;  %2329 = vmatmul.mubr.f32.gmra.mrb[48].mxu0 %v1047_v42  ;;  %v583_v19 = vsel %vm494_vm0, %v5109_v32, 0  ;;  %v3239_v42 = vsel %vm6151_vm14, 1.0, %v6203_v29  ;;  %vm339_vm6 = vcmp.eq.s32.totalorder %v5115_v5, %v4334_v27  ;;  %v1049_v23 = vand.u32 4294901760, %v1048_v61 }
 0x103   : > { %2336 = vmatprep.mubr.f32.mxu0 %v1056_v53  ;;  %6294 = vst [vmem:[#allocation116_spill] sm:$0xff] %v5121_v56  ;;  %v1077_v53 = vand.u32 4294901760, %v5101_v54  ;;  %v5135_v58 = vsub.f32 %v580_v20, %v580_v20  ;;  %v1058_v28 = vand.u32 4294901760, %v1057_v46  ;;  %v1072_v32 = vsub.f32 %v5084_v37, %v1071_v9 }
 0x104   : > { %1035 = vmatmul.mubr.f32.gmra.mrb[46].mxu1 %v1034_v11  ;;  %v1063_v11 = vsub.f32 %v5068_v57, %v1062_v12  ;;  %v1086_v30 = vand.u32 4294901760, %v5113_v1  ;;  %v3241_v61 = vsel %vm336_vm8, 1.0, %v6203_v29  ;;  %v5147_v57 = vsub.f32 %v3239_v42, %v3239_v42 }
 0x105   : > { %1044 = vmatprep.mubr.f32.mxu1 %v1043_v60  ;;  %6295 = vst [vmem:[#allocation117_spill] sm:$0xff] %v5135_v58  ;;  %v5145_v60 = vsub.f32 %v583_v19, %v583_v19  ;;  %v5150_v20 = vsel %vm339_vm6, 1.0, %v6203_v29  ;;  %vm341_vm14 = vcmp.eq.s32.totalorder %v5137_v35, %v4334_v27  ;;  %vm338_vm12 = vcmp.eq.s32.totalorder %v5115_v5, %v4331_v22 }
 0x106   : > { %2340 = vmatmul.mubr.f32.gmra.mrb[50].mxu0 %v1062_v12  ;;  %6298 = vst [vmem:[#allocation120_spill] sm:$0xff] %v5147_v57  ;;  %v1064_v46 = vand.u32 4294901760, %v1063_v11  ;;  %v1078_v12 = vsub.f32 %v5101_v54, %v1077_v53  ;;  %v1073_v19 = vand.u32 4294901760, %v1072_v32  ;;  %v1087_v42 = vsub.f32 %v5113_v1, %v1086_v30 }
 0x107   : > { %2347 = vmatprep.mubr.f32.mxu0 %v1071_v9  ;;  %6297 = vst [vmem:[#allocation119_spill] sm:$0xff] %v5145_v60  ;;  %v1092_v9 = vand.u32 4294901760, %v5121_v56  ;;  %v5162_v27 = vsub.f32 %v3241_v61, %v3241_v61  ;;  %vm340_vm6 = vcmp.eq.s32.totalorder %v5137_v35, %v4331_v22  ;;  %v5167_v11 = vsel %vm341_vm14, 1.0, %v6203_v29 }
 0x108   : > { %1050 = vmatmul.mubr.f32.gmra.mrb[48].mxu1 %v1049_v23  ;;  %v1101_v23 = vand.u32 4294901760, %v5135_v58  ;;  %v3243_v32 = vsel %vm338_vm12, 1.0, %v6203_v29  ;;  %v1088_v61 = vand.u32 4294901760, %v1087_v42  ;;  %v1116_v37 = vand.u32 4294901760, %v5145_v60 }
 0x109   : > { %1059 = vmatprep.mubr.f32.mxu1 %v1058_v28  ;;  %v586_v28 = vsel %vm494_vm0, %v5150_v20, 0  ;;  %6299 = vst [vmem:[#allocation121_spill] sm:$0xff] %v5162_v27  ;;  %v1093_v1 = vsub.f32 %v5121_v56, %v1092_v9  ;;  %v1122_v56 = vand.u32 4294901760, %v5162_v27 }
 0x10a   : > { %2351 = vmatmul.mubr.f32.gmra.mrb[52].mxu0 %v1077_v53  ;;  %v1079_v53 = vand.u32 4294901760, %v1078_v12  ;;  %v1102_v54 = vsub.f32 %v5135_v58, %v1101_v23  ;;  %v3245_v12 = vsel %vm340_vm6, 1.0, %v6203_v29 }
 0x10b   : > { %2358 = vmatprep.mubr.f32.mxu0 %v1086_v30  ;;  %v5175_v30 = vsub.f32 %v586_v28, %v586_v28  ;;  %v1094_v42 = vand.u32 4294901760, %v1093_v1  ;;  %v5195_v29 = vsub.f32 %v3245_v12, %v3245_v12  ;;  %v1123_v1 = vsub.f32 %v5162_v27, %v1122_v56  ;;  %v6384_v27 = vld [vmem:[#allocation106_spill] sm:$0xff] }
 0x10c   : > { %1065 = vmatmul.mubr.f32.gmra.mrb[50].mxu1 %v1064_v46  ;;  %v1107_v46 = vand.u32 4294901760, %v5147_v57 }
 0x10d   : > { %1074 = vmatprep.mubr.f32.mxu1 %v1073_v19  ;;  %6300 = vst [vmem:[#allocation122_spill] sm:$0xff] %v5175_v30  ;;  %v589_v19 = vsel %vm494_vm0, %v5167_v11, 0  ;;  %v1131_v35 = vand.u32 4294901760, %v5175_v30  ;;  %6303 = vst [vmem:[#allocation125_spill] sm:$0xff] %v5195_v29  ;;  %v1152_v12 = vand.u32 4294901760, %v5195_v29 }
 0x10e   : > { %2362 = vmatmul.mubr.f32.gmra.mrb[54].mxu0 %v1092_v9  ;;  %v5187_v9 = vsub.f32 %v3243_v32, %v3243_v32  ;;  %v1108_v58 = vsub.f32 %v5147_v57, %v1107_v46  ;;  %v5191_v5 = vsub.f32 %v589_v19, %v589_v19  ;;  %v6388_v57 = vld [vmem:[#allocation113_spill] sm:$0xff] }
 0x10f   : > { %2369 = vmatprep.mubr.f32.mxu0 %v1101_v23  ;;  %v1103_v23 = vand.u32 4294901760, %v1102_v54  ;;  %v1132_v19 = vsub.f32 %v5175_v30, %v1131_v35  ;;  %v6379_v30 = vld [vmem:[#allocation98_spill] sm:$0xff] }
 0x110   : > { %1080 = vmatmul.mubr.f32.gmra.mrb[52].mxu1 %v1079_v53  ;;  %6301 = vst [vmem:[#allocation123_spill] sm:$0xff] %v5187_v9  ;;  %6302 = vst [vmem:[#allocation124_spill] sm:$0xff] %v5191_v5  ;;  %v1117_v53 = vsub.f32 %v5145_v60, %v1116_v37  ;;  %v1109_v32 = vand.u32 4294901760, %v1108_v58  ;;  %v1146_v54 = vand.u32 4294901760, %v5191_v5  ;;  %v6386_v60 = vld [vmem:[#allocation109_spill] sm:$0xff] }
 0x111   : > { %1089 = vmatprep.mubr.f32.mxu1 %v1088_v61  ;;  %v1137_v61 = vand.u32 4294901760, %v5187_v9  ;;  %v1133_v58 = vand.u32 4294901760, %v1132_v19  ;;  %v6309_v19 = vld [vmem:[#allocation5_spill] sm:$0xff] }
 0x112   : > { %2373 = vmatmul.mubr.f32.gmra.mrb[56].mxu0 %v1107_v46  ;;  %v1118_v28 = vand.u32 4294901760, %v1117_v53  ;;  %v1124_v46 = vand.u32 4294901760, %v1123_v1  ;;  %v1153_v53 = vsub.f32 %v5195_v29, %v1152_v12  ;;  %v3514_v1 = vpack.c.bf16 %v4031_v17, %v4029_v16  ;;  %v6304_v16 = vld [vmem:[#allocation2_spill] sm:$0xff]  ;;  %v6305_v17 = vld [vmem:[#allocation3_spill] sm:$0xff]  ;;  %v6456_v29 = vld [vmem:[#allocation105_spill] sm:$0xff] }
 0x113   : > { %2380 = vmatprep.mubr.f32.mxu0 %v1116_v37  ;;  %v1138_v37 = vsub.f32 %v5187_v9, %v1137_v61  ;;  %v6377_v9 = vld [vmem:[#allocation91_spill] sm:$0xff] }
 0x114   : > { %1095 = vmatmul.mubr.f32.gmra.mrb[54].mxu1 %v1094_v42  ;;  %v1147_v42 = vsub.f32 %v5191_v5, %v1146_v54  ;;  %v6376_v5 = vld [vmem:[#allocation99_spill] sm:$0xff]  ;;  %v6475_v7 = vld [vmem:[#allocation122_spill] sm:$0xff] }
 0x115   : > { %1104 = vmatprep.mubr.f32.mxu1 %v1103_v23  ;;  %v1139_v23 = vand.u32 4294901760, %v1138_v37  ;;  %v6311_v37 = vld [vmem:[#allocation7_spill] sm:$0xff] }
 0x116   : > { %2384 = vmatmul.mubr.f32.gmra.mrb[58].mxu0 %v1122_v56  ;;  %v3547_v56 = vpack.c.bf16 %v4255_v39, %v4252_v25  ;;  %v6352_v25 = vld [vmem:[#allocation65_spill] sm:$0xff]  ;;  %v6353_v39 = vld [vmem:[#allocation59_spill] sm:$0xff] }
 0x117   : > { %2391 = vmatprep.mubr.f32.mxu0 %v1131_v35  ;;  %v1148_v35 = vand.u32 4294901760, %v1147_v42  ;;  %v6313_v42 = vld [vmem:[#allocation16_spill] sm:$0xff] }
 0x118   : > { %1110 = vmatmul.mubr.f32.gmra.mrb[56].mxu1 %v1109_v32  ;;  %v3970_v32 = vmov 1.0  }
 0x119   : > { %1119 = vmatprep.mubr.f32.mxu1 %v1118_v28  ;;  %v1154_v28 = vand.u32 4294901760, %v1153_v53 }
 0x11a   : > { %2395 = vmatmul.mubr.f32.gmra.mrb[60].mxu0 %v1137_v61  ;;  %v6308_v61 = vld [vmem:[#allocation4_spill] sm:$0xff] }
 0x11b   : > { %2402 = vmatprep.mubr.f32.mxu0 %v1146_v54  ;;  %v3523_v54 = vpack.c.bf16 %v6309_v19, %v6308_v61  ;;  %v6325_v61 = vld [vmem:[#allocation14_spill] sm:$0xff] }
 0x11c   : > { %1125 = vmatmul.mubr.f32.gmra.mrb[58].mxu1 %v1124_v46  ;;  %v6310_v46 = vld [vmem:[#allocation12_spill] sm:$0xff] }
 0x11d   : > { %1134 = vmatprep.mubr.f32.mxu1 %v1133_v58  ;;  %v6312_v58 = vld [vmem:[#allocation15_spill] sm:$0xff] }
 0x11e   : > { %2406 = vmatmul.mubr.f32.gmra.mrb[62].mxu0 %v1152_v12  ;;  %v3526_v12 = vpack.c.bf16 %v4115_v44, %v6311_v37  ;;  %v3529_v44 = vpack.c.bf16 %v4140_v51, %v4135_v50  ;;  %v6315_v50 = vld [vmem:[#allocation8_spill] sm:$0xff]  ;;  %v6316_v51 = vld [vmem:[#allocation9_spill] sm:$0xff] }
 0x11f   : > { %3311 = vmatprep.mubr.msk.f32.mxu0 %vm494_vm0, %v4353_v41  ;;  %v3532_v53 = vpack.c.bf16 %v6316_v51, %v6315_v50  ;;  %v6330_v37 = vld [vmem:[#allocation48_spill] sm:$0xff]  ;;  %v6341_v51 = vpack.c.bf16 %v4249_v24, %v4246_v36  ;;  %v6349_v36 = vld [vmem:[#allocation66_spill] sm:$0xff] }
 0x120   : > { %1140 = vmatmul.mubr.f32.gmra.mrb[60].mxu1 %v1139_v23  ;;  %v6314_v23 = vld [vmem:[#allocation37_spill] sm:$0xff]  ;;  %v6340_v50 = vld [vmem:[#allocation56_spill] sm:$0xff]  ;;  %v6350_v24 = vld [vmem:[#allocation58_spill] sm:$0xff] }
 0x121   : > { %1149 = vmatprep.mubr.f32.mxu1 %v1148_v35  ;;  %v6317_v35 = vld [vmem:[#allocation17_spill] sm:$0xff] }
 0x122   : > { %3312 = vmatmul.mubr.msk.f32.vlgmr.msra.gmra.mrb[0].mxu0 %vm278_vm1, %v3970_v32 }
 0x123   : > { %3313 = vmatprep.mubr.msk.f32.mxu0 %vm494_vm0, %v4376_v10  ;;  %3623 = vmatpush1.bf16.msra.mxu0 %v4027_v15  ;;  %v3517_v15 = vpack.c.bf16 %v4045_v21, %v4033_v18  ;;  %v3520_v18 = vpack.c.bf16 %v6305_v17, %v6304_v16  ;;  %v6306_v21 = vld [vmem:[#allocation6_spill] sm:$0xff]  ;;  %v6321_v17 = vld [vmem:[#allocation35_spill] sm:$0xff] }
 0x124   : > { %1155 = vmatmul.mubr.f32.gmra.mrb[62].mxu1 %v1154_v28  ;;  %3624 = vmatprep.subr.bf16.mxu0 %v6200_v4  ;;  %v6318_v28 = vld [vmem:[#allocation10_spill] sm:$0xff]  ;;  %vm6322_vm14 = vcmp.eq.s32.totalorder %v6321_v17, %v4331_v22 }
 0x125   : > { %3247 = vmatprep.mubr.msk.f32.mxu1 %vm494_vm0, %v4353_v41  ;;  %v6320_v16 = vld [vmem:[#allocation18_spill] sm:$0xff] }
 0x126   : > { %3314 = vmatmul.mubr.msk.f32.gmra.mrb[2].mxu0 %vm280_vm5, %v3970_v32 }
 0x127   : > { %3315 = vmatprep.mubr.msk.f32.mxu0 %vm494_vm0, %v4383_v47  ;;  %3626 = vmatpush1.bf16.msra.mxu0 %v4062_v26  ;;  %v6402_v26 = vld [vmem:[#allocation34_spill] sm:$0xff] }
 0x128   : > { %3248 = vmatmul.mubr.msk.f32.vlgmr.msra.gmra.mrb[0].mxu1 %vm278_vm1, %v3970_v32  ;;  %3627 = vmatprep.subr.bf16.mxu0 %v6200_v4 }
 0x129   : > { %3515 = vmatpush1.bf16.msra.mxu1 %v3514_v1  ;;  %3249 = vmatprep.mubr.msk.f32.mxu1 %vm494_vm0, %v4376_v10  ;;  %v6319_v1 = vld [vmem:[#allocation11_spill] sm:$0xff] }
 0x12a   : > { %3516 = vmatprep.subr.bf16.mxu1 %v6200_v4  ;;  %3316 = vmatmul.mubr.msk.f32.gmra.mrb[4].mxu0 %vm282_vm7, %v3970_v32 }
 0x12b   : > { %3317 = vmatprep.mubr.msk.f32.mxu0 %vm494_vm0, %v4404_v49  ;;  %3629 = vmatpush1.bf16.msra.mxu0 %v6306_v21  ;;  %v6324_v21 = vld [vmem:[#allocation13_spill] sm:$0xff] }
 0x12c   : > { %3250 = vmatmul.mubr.msk.f32.gmra.mrb[2].mxu1 %vm280_vm5, %v3970_v32  ;;  %3630 = vmatprep.subr.bf16.mxu0 %v6200_v4  ;;  %v3538_v19 = vpack.c.bf16 %v6325_v61, %v6324_v21  ;;  %v6361_v21 = vld [vmem:[#allocation79_spill] sm:$0xff]  ;;  %v6444_v61 = vld [vmem:[#allocation93_spill] sm:$0xff] }
 0x12d   : > { %3251 = vmatprep.mubr.msk.f32.mxu1 %vm494_vm0, %v4383_v47  ;;  %3518 = vmatpush1.bf16.msra.mxu1 %v3517_v15  ;;  %v3535_v15 = vpack.c.bf16 %v6319_v1, %v6318_v28  ;;  %v6346_v28 = vld [vmem:[#allocation61_spill] sm:$0xff]  ;;  %v6356_v1 = vld [vmem:[#allocation63_spill] sm:$0xff] }
 0x12e   : > { %3519 = vmatprep.subr.bf16.mxu1 %v6200_v4  ;;  %3318 = vmatmul.mubr.msk.f32.gmra.mrb[6].mxu0 %vm284_vm9, %v3970_v32 }
 0x12f   : > { %3319 = vmatprep.mubr.msk.f32.mxu0 %vm494_vm0, %v4438_v34  ;;  %3632 = vmatpush1.bf16.msra.mxu0 %v6310_v46  ;;  %v6327_v46 = vld [vmem:[#allocation40_spill] sm:$0xff] }
 0x130   : > { %3252 = vmatmul.mubr.msk.f32.gmra.mrb[4].mxu1 %vm282_vm7, %v3970_v32  ;;  %3633 = vmatprep.subr.bf16.mxu0 %v6200_v4 }
 0x131   : > { %3253 = vmatprep.mubr.msk.f32.mxu1 %vm494_vm0, %v4404_v49  ;;  %3521 = vmatpush1.bf16.msra.mxu1 %v3520_v18  ;;  %v6323_v18 = vld [vmem:[#allocation44_spill] sm:$0xff] }
 0x132   : > { %3522 = vmatprep.subr.bf16.mxu1 %v6200_v4  ;;  %3320 = vmatmul.mubr.msk.f32.gmra.mrb[8].mxu0 %vm286_vm11, %v3970_v32 }
 0x133   : > { %3321 = vmatprep.mubr.msk.f32.mxu0 %vm494_vm0, %v4471_v33  ;;  %3635 = vmatpush1.bf16.msra.mxu0 %v6312_v58  ;;  %v6331_v58 = vld [vmem:[#allocation20_spill] sm:$0xff] }
 0x134   : > { %3254 = vmatmul.mubr.msk.f32.gmra.mrb[6].mxu1 %vm284_vm9, %v3970_v32  ;;  %3636 = vmatprep.subr.bf16.mxu0 %v6200_v4 }
 0x135   : > { %3255 = vmatprep.mubr.msk.f32.mxu1 %vm494_vm0, %v4438_v34  ;;  %3524 = vmatpush1.bf16.msra.mxu1 %v3523_v54  ;;  %v6326_v54 = vld [vmem:[#allocation19_spill] sm:$0xff] }
 0x136   : > { %3525 = vmatprep.subr.bf16.mxu1 %v6200_v4  ;;  %3322 = vmatmul.mubr.msk.f32.gmra.mrb[10].mxu0 %vm288_vm13, %v3970_v32 }
 0x137   : > { %3323 = vmatprep.mubr.msk.f32.mxu0 %vm494_vm0, %v4504_v63  ;;  %3638 = vmatpush1.bf16.msra.mxu0 %v6313_v42  ;;  %v6335_v42 = vld [vmem:[#allocation52_spill] sm:$0xff] }
 0x138   : > { %3256 = vmatmul.mubr.msk.f32.gmra.mrb[8].mxu1 %vm286_vm11, %v3970_v32  ;;  %3639 = vmatprep.subr.bf16.mxu0 %v6200_v4 }
 0x139   : > { %3257 = vmatprep.mubr.msk.f32.mxu1 %vm494_vm0, %v4471_v33  ;;  %3527 = vmatpush1.bf16.msra.mxu1 %v3526_v12  ;;  %v3541_v12 = vpack.c.bf16 %v4239_v31, %v4225_v14  ;;  %v6336_v14 = vld [vmem:[#allocation21_spill] sm:$0xff]  ;;  %v6337_v31 = vld [vmem:[#allocation47_spill] sm:$0xff] }
 0x13a   : > { %3528 = vmatprep.subr.bf16.mxu1 %v6200_v4  ;;  %3324 = vmatmul.mubr.msk.f32.gmra.mrb[12].mxu0 %vm6163_vm15, %v3970_v32 }
 0x13b   : > { %3325 = vmatprep.mubr.msk.f32.mxu0 %vm494_vm0, %v6314_v23  ;;  %3641 = vmatpush1.bf16.msra.mxu0 %v6317_v35  ;;  %v6343_v35 = vld [vmem:[#allocation50_spill] sm:$0xff] }
 0x13c   : > { %3258 = vmatmul.mubr.msk.f32.gmra.mrb[10].mxu1 %vm288_vm13, %v3970_v32  ;;  %3642 = vmatprep.subr.bf16.mxu0 %v6200_v4 }
 0x13d   : > { %3259 = vmatprep.mubr.msk.f32.mxu1 %vm494_vm0, %v4504_v63  ;;  %3530 = vmatpush1.bf16.msra.mxu1 %v3529_v44  ;;  %v6332_v44 = vld [vmem:[#allocation42_spill] sm:$0xff] }
 0x13e   : > { %3531 = vmatprep.subr.bf16.mxu1 %v6200_v4  ;;  %3326 = vmatmul.mubr.msk.f32.gmra.mrb[14].mxu0 %vm6162_vm3, %v3970_v32 }
 0x13f   : > { %3327 = vmatprep.mubr.msk.f32.mxu0 %vm494_vm0, %v4571_v45  ;;  %3644 = vmatpush1.bf16.msra.mxu0 %v6320_v16  ;;  %v6359_v16 = vld [vmem:[#allocation67_spill] sm:$0xff] }
 0x140   : > { %3260 = vmatmul.mubr.msk.f32.gmra.mrb[12].mxu1 %vm6163_vm15, %v3970_v32  ;;  %3645 = vmatprep.subr.bf16.mxu0 %v6200_v4 }
 0x141   : > { %3261 = vmatprep.mubr.msk.f32.mxu1 %vm494_vm0, %v6314_v23  ;;  %3533 = vmatpush1.bf16.msra.mxu1 %v3532_v53  ;;  %v6342_v53 = vld [vmem:[#allocation22_spill] sm:$0xff] }
 0x142   : > { %3534 = vmatprep.subr.bf16.mxu1 %v6200_v4  ;;  %3328 = vmatmul.mubr.msk.f32.gmra.mrb[16].mxu0 %vm6322_vm14, %v3970_v32  ;;  %vm6328_vm14 = vcmp.eq.s32.totalorder %v6327_v46, %v4331_v22 }
 0x143   : > { %3329 = vmatprep.mubr.msk.f32.mxu0 %vm494_vm0, %v6323_v18  ;;  %3647 = vmatpush1.bf16.msra.mxu0 %v6326_v54  ;;  %v6447_v54 = vld [vmem:[#allocation95_spill] sm:$0xff] }
 0x144   : > { %3262 = vmatmul.mubr.msk.f32.gmra.mrb[14].mxu1 %vm6162_vm3, %v3970_v32  ;;  %3648 = vmatprep.subr.bf16.mxu0 %v6200_v4  ;;  %vm6329_vm3 = vcmp.eq.s32.totalorder %v6321_v17, %v4331_v22 }
 0x145   : > { %3263 = vmatprep.mubr.msk.f32.mxu1 %vm494_vm0, %v4571_v45  ;;  %3536 = vmatpush1.bf16.msra.mxu1 %v3535_v15  ;;  %v6358_v15 = vld [vmem:[#allocation73_spill] sm:$0xff] }
 0x146   : > { %3537 = vmatprep.subr.bf16.mxu1 %v6200_v4  ;;  %3330 = vmatmul.mubr.msk.f32.gmra.mrb[18].mxu0 %vm6328_vm14, %v3970_v32  ;;  %vm6333_vm14 = vcmp.eq.s32.totalorder %v6332_v44, %v4331_v22 }
 0x147   : > { %3331 = vmatprep.mubr.msk.f32.mxu0 %vm494_vm0, %v6330_v37  ;;  %3650 = vmatpush1.bf16.msra.mxu0 %v6331_v58  ;;  %v6367_v58 = vld [vmem:[#allocation83_spill] sm:$0xff] }
 0x148   : > { %3264 = vmatmul.mubr.msk.f32.gmra.mrb[16].mxu1 %vm6329_vm3, %v3970_v32  ;;  %3651 = vmatprep.subr.bf16.mxu0 %v6200_v4  ;;  %vm6334_vm3 = vcmp.eq.s32.totalorder %v6327_v46, %v4331_v22 }
 0x149   : > { %3265 = vmatprep.mubr.msk.f32.mxu1 %vm494_vm0, %v6323_v18  ;;  %3539 = vmatpush1.bf16.msra.mxu1 %v3538_v19  ;;  %v6364_v19 = vld [vmem:[#allocation85_spill] sm:$0xff] }
 0x14a   : > { %3540 = vmatprep.subr.bf16.mxu1 %v6200_v4  ;;  %3332 = vmatmul.mubr.msk.f32.gmra.mrb[20].mxu0 %vm6333_vm14, %v3970_v32  ;;  %vm6338_vm14 = vcmp.eq.s32.totalorder %v6337_v31, %v4331_v22 }
 0x14b   : > { %3333 = vmatprep.mubr.msk.f32.mxu0 %vm494_vm0, %v6335_v42  ;;  %3653 = vmatpush1.bf16.msra.mxu0 %v6336_v14  ;;  %v6369_v14 = vld [vmem:[#allocation87_spill] sm:$0xff] }
 0x14c   : > { %3266 = vmatmul.mubr.msk.f32.gmra.mrb[18].mxu1 %vm6334_vm3, %v3970_v32  ;;  %3654 = vmatprep.subr.bf16.mxu0 %v6200_v4  ;;  %vm6339_vm3 = vcmp.eq.s32.totalorder %v6332_v44, %v4331_v22 }
 0x14d   : > { %3267 = vmatprep.mubr.msk.f32.mxu1 %vm494_vm0, %v6330_v37  ;;  %3542 = vmatpush1.bf16.msra.mxu1 %v3541_v12  ;;  %v6366_v12 = vld [vmem:[#allocation88_spill] sm:$0xff] }
 0x14e   : > { %3543 = vmatprep.subr.bf16.mxu1 %v6200_v4  ;;  %3334 = vmatmul.mubr.msk.f32.gmra.mrb[22].mxu0 %vm6338_vm14, %v3970_v32  ;;  %vm6344_vm14 = vcmp.eq.s32.totalorder %v6343_v35, %v4331_v22 }
 0x14f   : > { %3335 = vmatprep.mubr.msk.f32.mxu0 %vm494_vm0, %v6340_v50  ;;  %3656 = vmatpush1.bf16.msra.mxu0 %v6342_v53  ;;  %v6373_v53 = vld [vmem:[#allocation100_spill] sm:$0xff] }
 0x150   : > { %3268 = vmatmul.mubr.msk.f32.gmra.mrb[20].mxu1 %vm6339_vm3, %v3970_v32  ;;  %vm6345_vm3 = vcmp.eq.s32.totalorder %v6337_v31, %v4331_v22 }
 0x151   : > { %3269 = vmatprep.mubr.msk.f32.mxu1 %vm494_vm0, %v6335_v42  ;;  %3545 = vmatpush1.bf16.msra.mxu1 %v6341_v51  ;;  %v6370_v51 = vld [vmem:[#allocation80_spill] sm:$0xff] }
 0x152   : > { %3546 = vmatprep.subr.bf16.mxu1 %v6200_v4  ;;  %3336 = vmatmul.mubr.msk.f32.gmra.mrb[24].mxu0 %vm6344_vm14, %v3970_v32  ;;  %v6347_v4 = vld [vmem:[#allocation54_spill] sm:$0xff] }
 0x153   : > { %3337 = vmatprep.mubr.msk.f32.mxu0 %vm494_vm0, %v6346_v28  ;;  %vm6348_vm15 = vcmp.eq.s32.totalorder %v6347_v4, %v4331_v22 }
 0x154   : > { %3270 = vmatmul.mubr.msk.f32.gmra.mrb[22].mxu1 %vm6345_vm3, %v3970_v32  ;;  %vm6351_vm3 = vcmp.eq.s32.totalorder %v6350_v24, %v4331_v22 }
 0x155   : > { %3271 = vmatprep.mubr.msk.f32.mxu1 %vm494_vm0, %v6340_v50  ;;  %3548 = vmatpush1.bf16.msra.mxu1 %v3547_v56  ;;  %v6355_v56 = vld [vmem:[#allocation69_spill] sm:$0xff] }
 0x156   : > { %3338 = vmatmul.mubr.msk.f32.gmra.mrb[26].mxu0 %vm6348_vm15, %v3970_v32 }
 0x157   : > { %3339 = vmatprep.mubr.msk.f32.mxu0 %vm494_vm0, %v6349_v36 }
 0x158   : > { %3272 = vmatmul.mubr.msk.f32.gmra.mrb[24].mxu1 %vm6344_vm14, %v3970_v32  ;;  %vm6354_vm14 = vcmp.eq.s32.totalorder %v6353_v39, %v4331_v22 }
 0x159   : > { %3273 = vmatprep.mubr.msk.f32.mxu1 %vm494_vm0, %v6346_v28 }
 0x15a   : > { %3340 = vmatmul.mubr.msk.f32.gmra.mrb[28].mxu0 %vm6351_vm3, %v3970_v32 }
 0x15b   : > { %3341 = vmatprep.mubr.msk.f32.mxu0 %vm494_vm0, %v6352_v25 }
 0x15c   : > { %3274 = vmatmul.mubr.msk.f32.gmra.mrb[26].mxu1 %vm6348_vm15, %v3970_v32  ;;  %vm6357_vm15 = vcmp.eq.s32.totalorder %v6356_v1, %v4331_v22 }
 0x15d   : > { %3275 = vmatprep.mubr.msk.f32.mxu1 %vm494_vm0, %v6349_v36 }
 0x15e   : > { %3342 = vmatmul.mubr.msk.f32.gmra.mrb[30].mxu0 %vm6354_vm14, %v3970_v32 }
 0x15f   : > { %3343 = vmatprep.mubr.msk.f32.mxu0 %vm494_vm0, %v6355_v56 }
 0x160   : > { %3276 = vmatmul.mubr.msk.f32.gmra.mrb[28].mxu1 %vm6351_vm3, %v3970_v32  ;;  %vm6360_vm3 = vcmp.eq.s32.totalorder %v6359_v16, %v4331_v22 }
 0x161   : > { %3277 = vmatprep.mubr.msk.f32.mxu1 %vm494_vm0, %v6352_v25 }
 0x162   : > { %3344 = vmatmul.mubr.msk.f32.gmra.mrb[32].mxu0 %vm6357_vm15, %v3970_v32 }
 0x163   : > { %3345 = vmatprep.mubr.msk.f32.mxu0 %vm494_vm0, %v6358_v15 }
 0x164   : > { %3278 = vmatmul.mubr.msk.f32.gmra.mrb[30].mxu1 %vm6354_vm14, %v3970_v32  ;;  %vm6363_vm14 = vmmov %vm6360_vm3 }
 0x165   : > { %3279 = vmatprep.mubr.msk.f32.mxu1 %vm494_vm0, %v6355_v56 }
 0x166   : > { %3346 = vmatmul.mubr.msk.f32.gmra.mrb[34].mxu0 %vm6360_vm3, %v3970_v32  ;;  %vm6368_vm3 = vcmp.eq.s32.totalorder %v6367_v58, %v4331_v22 }
 0x167   : > { %3347 = vmatprep.mubr.msk.f32.mxu0 %vm494_vm0, %v6361_v21 }
 0x168   : > { %3280 = vmatmul.mubr.msk.f32.gmra.mrb[32].mxu1 %vm6357_vm15, %v3970_v32  ;;  %vm6371_vm15 = vcmp.eq.s32.totalorder %v6370_v51, %v4331_v22 }
 0x169   : > { %3281 = vmatprep.mubr.msk.f32.mxu1 %vm494_vm0, %v6358_v15 }
 0x16a   : > { %3348 = vmatmul.mubr.msk.f32.gmra.mrb[36].mxu0 %vm314_vm2, %v3970_v32 }
 0x16b   : > { %3349 = vmatprep.mubr.msk.f32.mxu0 %vm494_vm0, %v6364_v19 }
 0x16c   : > { %3282 = vmatmul.mubr.msk.f32.gmra.mrb[34].mxu1 %vm6363_vm14, %v3970_v32  ;;  %vm6372_vm14 = vmmov %vm6368_vm3 }
 0x16d   : > { %3283 = vmatprep.mubr.msk.f32.mxu1 %vm494_vm0, %v6361_v21 }
 0x16e   : > { %3350 = vmatmul.mubr.msk.f32.gmra.mrb[38].mxu0 %vm316_vm4, %v3970_v32 }
 0x16f   : > { %3351 = vmatprep.mubr.msk.f32.mxu0 %vm494_vm0, %v6366_v12 }
 0x170   : > { %3284 = vmatmul.mubr.msk.f32.gmra.mrb[36].mxu1 %vm314_vm2, %v3970_v32 }
 0x171   : > { %3285 = vmatprep.mubr.msk.f32.mxu1 %vm494_vm0, %v6364_v19 }
 0x172   : > { %3352 = vmatmul.mubr.msk.f32.gmra.mrb[40].mxu0 %vm6368_vm3, %v3970_v32  ;;  %vm6375_vm3 = vmmov %vm6371_vm15 }
 0x173   : > { %3353 = vmatprep.mubr.msk.f32.mxu0 %vm494_vm0, %v6369_v14 }
 0x174   : > { %3286 = vmatmul.mubr.msk.f32.gmra.mrb[38].mxu1 %vm316_vm4, %v3970_v32 }
 0x175   : > { %3287 = vmatprep.mubr.msk.f32.mxu1 %vm494_vm0, %v6366_v12 }
 0x176   : > { %3354 = vmatmul.mubr.msk.f32.gmra.mrb[42].mxu0 %vm6371_vm15, %v3970_v32  ;;  %vm6378_vm15 = vcmp.eq.s32.totalorder %v6377_v9, %v4331_v22 }
 0x177   : > { %3355 = vmatprep.mubr.msk.f32.mxu0 %vm494_vm0, %v6373_v53 }
 0x178   : > { %3288 = vmatmul.mubr.msk.f32.gmra.mrb[40].mxu1 %vm6372_vm14, %v3970_v32  ;;  %vm6380_vm14 = vcmp.eq.s32.totalorder %v6379_v30, %v4331_v22 }
 0x179   : > { %3289 = vmatprep.mubr.msk.f32.mxu1 %vm494_vm0, %v6369_v14 }
 0x17a   : > { %3356 = vmatmul.mubr.msk.f32.gmra.mrb[44].mxu0 %vm322_vm10, %v3970_v32 }
 0x17b   : > { %3357 = vmatprep.mubr.msk.f32.mxu0 %vm494_vm0, %v6376_v5 }
 0x17c   : > { %3290 = vmatmul.mubr.msk.f32.gmra.mrb[42].mxu1 %vm6375_vm3, %v3970_v32  ;;  %vm6381_vm3 = vmmov %vm6378_vm15 }
 0x17d   : > { %3291 = vmatprep.mubr.msk.f32.mxu1 %vm494_vm0, %v6373_v53 }
 0x17e   : > { %3358 = vmatmul.mubr.msk.f32.gmra.mrb[46].mxu0 %vm6378_vm15, %v3970_v32  ;;  %vm6382_vm15 = vcmp.eq.s32.totalorder %v4977_v13, %v4331_v22 }
 0x17f   : > { %3359 = vmatprep.mubr.msk.f32.mxu0 %vm494_vm0, %v4983_v59 }
 0x180   : > { %3292 = vmatmul.mubr.msk.f32.gmra.mrb[44].mxu1 %vm322_vm10, %v3970_v32 }
 0x181   : > { %3293 = vmatprep.mubr.msk.f32.mxu1 %vm494_vm0, %v6376_v5 }
 0x182   : > { %3360 = vmatmul.mubr.msk.f32.gmra.mrb[48].mxu0 %vm6380_vm14, %v3970_v32 }
 0x183   : > { %3361 = vmatprep.mubr.msk.f32.mxu0 %vm494_vm0, %v5022_v0 }
 0x184   : > { %3294 = vmatmul.mubr.msk.f32.gmra.mrb[46].mxu1 %vm6381_vm3, %v3970_v32  ;;  %vm6383_vm3 = vcmp.eq.s32.totalorder %v4988_v8, %v4331_v22 }
 0x185   : > { %3295 = vmatprep.mubr.msk.f32.mxu1 %vm494_vm0, %v4983_v59 }
 0x186   : > { %3362 = vmatmul.mubr.msk.f32.gmra.mrb[50].mxu0 %vm6382_vm15, %v3970_v32 }
 0x187   : > { %3363 = vmatprep.mubr.msk.f32.mxu0 %vm494_vm0, %v5034_v43 }
 0x188   : > { %3296 = vmatmul.mubr.msk.f32.gmra.mrb[48].mxu1 %vm6380_vm14, %v3970_v32  ;;  %vm6385_vm14 = vcmp.eq.s32.totalorder %v6384_v27, %v4331_v22  ;;  %v6392_v27 = vld [vmem:[#allocation23_spill] sm:$0xff] }
 0x189   : > { %3297 = vmatprep.mubr.msk.f32.mxu1 %vm494_vm0, %v5022_v0 }
 0x18a   : > { %3364 = vmatmul.mubr.msk.f32.gmra.mrb[52].mxu0 %vm6383_vm3, %v3970_v32 }
 0x18b   : > { %3365 = vmatprep.mubr.msk.f32.mxu0 %vm494_vm0, %v5078_v48 }
 0x18c   : > { %3298 = vmatmul.mubr.msk.f32.gmra.mrb[50].mxu1 %vm6382_vm15, %v3970_v32  ;;  %vm6387_vm15 = vcmp.eq.s32.totalorder %v6386_v60, %v4331_v22 }
 0x18d   : > { %3299 = vmatprep.mubr.msk.f32.mxu1 %vm494_vm0, %v5034_v43 }
 0x18e   : > { %3366 = vmatmul.mubr.msk.f32.gmra.mrb[54].mxu0 %vm6385_vm14, %v3970_v32 }
 0x18f   : > { %3367 = vmatprep.mubr.msk.f32.mxu0 %vm494_vm0, %v5106_v2 }
 0x190   : > { %3300 = vmatmul.mubr.msk.f32.gmra.mrb[52].mxu1 %vm6383_vm3, %v3970_v32  ;;  %vm6389_vm3 = vmmov %vm6387_vm15 }
 0x191   : > { %3301 = vmatprep.mubr.msk.f32.mxu1 %vm494_vm0, %v5078_v48 }
 0x192   : > { %3368 = vmatmul.mubr.msk.f32.gmra.mrb[56].mxu0 %vm6387_vm15, %v3970_v32  ;;  %vm6421_vm15 = vcmp.eq.s32.totalorder %v6343_v35, %v4331_v22  ;;  %v6428_v35 = vld [vmem:[#allocation70_spill] sm:$0xff] }
 0x193   : > { %3369 = vmatprep.mubr.msk.f32.mxu0 %vm494_vm0, %v6388_v57 }
 0x194   : > { %3302 = vmatmul.mubr.msk.f32.gmra.mrb[54].mxu1 %vm6385_vm14, %v3970_v32  ;;  %vm6424_vm14 = vcmp.eq.s32.totalorder %v6347_v4, %v4331_v22  ;;  %v6431_v4 = vld [vmem:[#allocation76_spill] sm:$0xff] }
 0x195   : > { %3303 = vmatprep.mubr.msk.f32.mxu1 %vm494_vm0, %v5106_v2 }
 0x196   : > { %3370 = vmatmul.mubr.msk.f32.gmra.mrb[58].mxu0 %vm336_vm8, %v3970_v32 }
 0x197   : > { %3371 = vmatprep.mubr.msk.f32.mxu0 %vm494_vm0, %v5150_v20 }
 0x198   : > { %3304 = vmatmul.mubr.msk.f32.gmra.mrb[56].mxu1 %vm6389_vm3, %v3970_v32  ;;  %vm6427_vm3 = vcmp.eq.s32.totalorder %v6350_v24, %v4331_v22  ;;  %v6434_v24 = vld [vmem:[#allocation77_spill] sm:$0xff] }
 0x199   : > { %3305 = vmatprep.mubr.msk.f32.mxu1 %vm494_vm0, %v6388_v57 }
 0x19a   : > { %3372 = vmatmul.mubr.msk.f32.gmra.mrb[60].mxu0 %vm338_vm12, %v3970_v32 }
 0x19b   : > { %3373 = vmatprep.mubr.msk.f32.mxu0 %vm494_vm0, %v5167_v11 }
 0x19c   : > { %3306 = vmatmul.mubr.msk.f32.gmra.mrb[58].mxu1 %vm336_vm8, %v3970_v32 }
 0x19d   : > { %3307 = vmatprep.mubr.msk.f32.mxu1 %vm494_vm0, %v5150_v20 }
 0x19e   : > { %3374 = vmatmul.mubr.msk.f32.gmra.mrb[62].mxu0 %vm340_vm6, %v3970_v32 }
 0x19f   : > { %3375 = vmatprep.mubr.msk.f32.mxu0 %vm494_vm0, %v4353_v41  ;;  %v6393_v41 = vld [vmem:[#allocation24_spill] sm:$0xff] }
 0x1a0   : > { %3308 = vmatmul.mubr.msk.f32.gmra.mrb[60].mxu1 %vm338_vm12, %v3970_v32 }
 0x1a1   : > { %3309 = vmatprep.mubr.msk.f32.mxu1 %vm494_vm0, %v5167_v11 }
 0x1a2   : > { %3376 = vmatmul.mubr.msk.f32.vlgmr.msra.gmra.mrb[0].mxu0 %vm278_vm1, %v3970_v32  ;;  %vm6403_vm1 = vcmp.eq.s32.totalorder %v4460_v38, %v4331_v22  ;;  %v6410_v38 = vld [vmem:[#allocation43_spill] sm:$0xff] }
 0x1a3   : > { %3377 = vmatprep.mubr.msk.f32.mxu0 %vm494_vm0, %v4376_v10  ;;  %v6395_v10 = vld [vmem:[#allocation27_spill] sm:$0xff] }
 0x1a4   : > { %3310 = vmatmul.mubr.msk.f32.gmra.mrb[62].mxu1 %vm340_vm6, %v3970_v32 }
 0x1a5   : > { %1683 = vmatprep.mubr.f32.mxu1 %v6392_v27  ;;  %v6396_v27 = vld [vmem:[#allocation28_spill] sm:$0xff] }
 0x1a6   : > { %3378 = vmatmul.mubr.msk.f32.gmra.mrb[2].mxu0 %vm280_vm5, %v3970_v32  ;;  %vm6406_vm5 = vcmp.eq.s32.totalorder %v4493_v55, %v4331_v22  ;;  %v6413_v55 = vld [vmem:[#allocation46_spill] sm:$0xff] }
 0x1a7   : > { %3379 = vmatprep.mubr.msk.f32.mxu0 %vm494_vm0, %v4383_v47  ;;  %v6398_v47 = vld [vmem:[#allocation30_spill] sm:$0xff] }
 0x1a8   : > { %1686 = vmatmul.mubr.f32.vlgmr.msra.gmra.mrb[0].mxu1 %v6393_v41  ;;  %v6466_v41 = vld [vmem:[#allocation114_spill] sm:$0xff] }
 0x1a9   : > { %1692 = vmatprep.mubr.f32.mxu1 %v6394_v40  ;;  %v6470_v40 = vld [vmem:[#allocation117_spill] sm:$0xff] }
 0x1aa   : > { %3380 = vmatmul.mubr.msk.f32.gmra.mrb[4].mxu0 %vm282_vm7, %v3970_v32  ;;  %vm6409_vm7 = vcmp.eq.s32.totalorder %v6321_v17, %v4331_v22  ;;  %v6416_v17 = vld [vmem:[#allocation51_spill] sm:$0xff] }
 0x1ab   : > { %3381 = vmatprep.mubr.msk.f32.mxu0 %vm494_vm0, %v4404_v49  ;;  %v6399_v49 = vld [vmem:[#allocation31_spill] sm:$0xff] }
 0x1ac   : > { %1695 = vmatmul.mubr.f32.gmra.mrb[2].mxu1 %v6395_v10  ;;  %v6472_v10 = vld [vmem:[#allocation119_spill] sm:$0xff] }
 0x1ad   : > { %1701 = vmatprep.mubr.f32.mxu1 %v6396_v27 }
 0x1ae   : > { %3382 = vmatmul.mubr.msk.f32.gmra.mrb[6].mxu0 %vm284_vm9, %v3970_v32  ;;  %vm6412_vm9 = vcmp.eq.s32.totalorder %v6327_v46, %v4331_v22  ;;  %v6419_v46 = vld [vmem:[#allocation55_spill] sm:$0xff] }
 0x1af   : > { %3383 = vmatprep.mubr.msk.f32.mxu0 %vm494_vm0, %v4438_v34  ;;  %v6401_v34 = vld [vmem:[#allocation33_spill] sm:$0xff] }
 0x1b0   : > { %1704 = vmatmul.mubr.f32.gmra.mrb[4].mxu1 %v6397_v3  ;;  %v6477_v3 = vld [vmem:[#allocation124_spill] sm:$0xff] }
 0x1b1   : > { %1710 = vmatprep.mubr.f32.mxu1 %v6398_v47  ;;  %v6478_v47 = vld [vmem:[#allocation125_spill] sm:$0xff] }
 0x1b2   : > { %3384 = vmatmul.mubr.msk.f32.gmra.mrb[8].mxu0 %vm286_vm11, %v3970_v32  ;;  %vm6415_vm11 = vcmp.eq.s32.totalorder %v6332_v44, %v4331_v22  ;;  %v6422_v44 = vld [vmem:[#allocation60_spill] sm:$0xff] }
 0x1b3   : > { %3385 = vmatprep.mubr.msk.f32.mxu0 %vm494_vm0, %v4471_v33  ;;  %v6405_v33 = vld [vmem:[#allocation38_spill] sm:$0xff] }
 0x1b4   : > { %1713 = vmatmul.mubr.f32.gmra.mrb[6].mxu1 %v6399_v49 }
 0x1b5   : > { %1719 = vmatprep.mubr.f32.mxu1 %v6400_v62 }
 0x1b6   : > { %3386 = vmatmul.mubr.msk.f32.gmra.mrb[10].mxu0 %vm288_vm13, %v3970_v32  ;;  %vm6418_vm13 = vcmp.eq.s32.totalorder %v6337_v31, %v4331_v22  ;;  %v6425_v31 = vld [vmem:[#allocation64_spill] sm:$0xff] }
 0x1b7   : > { %3387 = vmatprep.mubr.msk.f32.mxu0 %vm494_vm0, %v4504_v63  ;;  %v6408_v63 = vld [vmem:[#allocation41_spill] sm:$0xff] }
 0x1b8   : > { %1722 = vmatmul.mubr.f32.gmra.mrb[8].mxu1 %v6401_v34 }
 0x1b9   : > { %1728 = vmatprep.mubr.f32.mxu1 %v6402_v26 }
 0x1ba   : > { %3388 = vmatmul.mubr.msk.f32.gmra.mrb[12].mxu0 %vm6403_vm1, %v3970_v32  ;;  %vm6430_vm1 = vcmp.eq.s32.totalorder %v6353_v39, %v4331_v22  ;;  %v6437_v39 = vld [vmem:[#allocation82_spill] sm:$0xff] }
 0x1bb   : > { %3389 = vmatprep.mubr.msk.f32.mxu0 %vm494_vm0, %v6314_v23  ;;  %v6411_v23 = vld [vmem:[#allocation45_spill] sm:$0xff] }
 0x1bc   : > { %1731 = vmatmul.mubr.f32.gmra.mrb[10].mxu1 %v6404_v6 }
 0x1bd   : > { %1737 = vmatprep.mubr.f32.mxu1 %v6405_v33 }
 0x1be   : > { %3390 = vmatmul.mubr.msk.f32.gmra.mrb[14].mxu0 %vm6406_vm5, %v3970_v32  ;;  %vm6433_vm5 = vcmp.eq.s32.totalorder %v6356_v1, %v4331_v22  ;;  %v6439_v1 = vld [vmem:[#allocation84_spill] sm:$0xff] }
 0x1bf   : > { %3391 = vmatprep.mubr.msk.f32.mxu0 %vm494_vm0, %v4571_v45  ;;  %v6414_v45 = vld [vmem:[#allocation49_spill] sm:$0xff] }
 0x1c0   : > { %1740 = vmatmul.mubr.f32.gmra.mrb[12].mxu1 %v6407_v52 }
 0x1c1   : > { %1746 = vmatprep.mubr.f32.mxu1 %v6408_v63 }
 0x1c2   : > { %3392 = vmatmul.mubr.msk.f32.gmra.mrb[16].mxu0 %vm6409_vm7, %v3970_v32  ;;  %vm6436_vm7 = vcmp.eq.s32.totalorder %v6359_v16, %v4331_v22  ;;  %v6441_v16 = vld [vmem:[#allocation90_spill] sm:$0xff] }
 0x1c3   : > { %3393 = vmatprep.mubr.msk.f32.mxu0 %vm494_vm0, %v6323_v18  ;;  %v6417_v18 = vld [vmem:[#allocation53_spill] sm:$0xff] }
 0x1c4   : > { %1749 = vmatmul.mubr.f32.gmra.mrb[14].mxu1 %v6410_v38 }
 0x1c5   : > { %1755 = vmatprep.mubr.f32.mxu1 %v6411_v23 }
 0x1c6   : > { %3394 = vmatmul.mubr.msk.f32.gmra.mrb[18].mxu0 %vm6412_vm9, %v3970_v32  ;;  %vm6451_vm9 = vcmp.eq.s32.totalorder %v6377_v9, %v4331_v22  ;;  %v6459_v9 = vld [vmem:[#allocation108_spill] sm:$0xff] }
 0x1c7   : > { %3395 = vmatprep.mubr.msk.f32.mxu0 %vm494_vm0, %v6330_v37  ;;  %v6420_v37 = vld [vmem:[#allocation57_spill] sm:$0xff] }
 0x1c8   : > { %1758 = vmatmul.mubr.f32.gmra.mrb[16].mxu1 %v6413_v55 }
 0x1c9   : > { %1764 = vmatprep.mubr.f32.mxu1 %v6414_v45 }
 0x1ca   : > { %3396 = vmatmul.mubr.msk.f32.gmra.mrb[20].mxu0 %vm6415_vm11, %v3970_v32  ;;  %vm6457_vm11 = vcmp.eq.s32.totalorder %v4977_v13, %v4331_v22  ;;  %v6463_v13 = vld [vmem:[#allocation106_spill] sm:$0xff] }
 0x1cb   : > { %3397 = vmatprep.mubr.msk.f32.mxu0 %vm494_vm0, %v6335_v42  ;;  %v6423_v42 = vld [vmem:[#allocation62_spill] sm:$0xff] }
 0x1cc   : > { %1767 = vmatmul.mubr.f32.gmra.mrb[18].mxu1 %v6416_v17 }
 0x1cd   : > { %1773 = vmatprep.mubr.f32.mxu1 %v6417_v18 }
 0x1ce   : > { %3398 = vmatmul.mubr.msk.f32.gmra.mrb[22].mxu0 %vm6418_vm13, %v3970_v32  ;;  %vm6460_vm13 = vcmp.eq.s32.totalorder %v4988_v8, %v4331_v22  ;;  %v6467_v8 = vld [vmem:[#allocation109_spill] sm:$0xff] }
 0x1cf   : > { %3399 = vmatprep.mubr.msk.f32.mxu0 %vm494_vm0, %v6340_v50  ;;  %v6426_v50 = vld [vmem:[#allocation68_spill] sm:$0xff] }
 0x1d0   : > { %1776 = vmatmul.mubr.f32.gmra.mrb[20].mxu1 %v6419_v46 }
 0x1d1   : > { %1782 = vmatprep.mubr.f32.mxu1 %v6420_v37 }
 0x1d2   : > { %3400 = vmatmul.mubr.msk.f32.gmra.mrb[24].mxu0 %vm6421_vm15, %v3970_v32  ;;  %vm6464_vm15 = vcmp.eq.s32.totalorder %v6463_v13, %v4331_v22 }
 0x1d3   : > { %3401 = vmatprep.mubr.msk.f32.mxu0 %vm494_vm0, %v6346_v28  ;;  %v6429_v28 = vld [vmem:[#allocation72_spill] sm:$0xff] }
 0x1d4   : > { %1785 = vmatmul.mubr.f32.gmra.mrb[22].mxu1 %v6422_v44 }
 0x1d5   : > { %1791 = vmatprep.mubr.f32.mxu1 %v6423_v42 }
 0x1d6   : > { %3402 = vmatmul.mubr.msk.f32.gmra.mrb[26].mxu0 %vm6424_vm14, %v3970_v32  ;;  %vm6468_vm14 = vcmp.eq.s32.totalorder %v6467_v8, %v4331_v22 }
 0x1d7   : > { %3403 = vmatprep.mubr.msk.f32.mxu0 %vm494_vm0, %v6349_v36  ;;  %v6432_v36 = vld [vmem:[#allocation75_spill] sm:$0xff] }
 0x1d8   : > { %1794 = vmatmul.mubr.f32.gmra.mrb[24].mxu1 %v6425_v31 }
 0x1d9   : > { %1800 = vmatprep.mubr.f32.mxu1 %v6426_v50 }
 0x1da   : > { %3404 = vmatmul.mubr.msk.f32.gmra.mrb[28].mxu0 %vm6427_vm3, %v3970_v32 }
 0x1db   : > { %3405 = vmatprep.mubr.msk.f32.mxu0 %vm494_vm0, %v6352_v25  ;;  %v6435_v25 = vld [vmem:[#allocation78_spill] sm:$0xff] }
 0x1dc   : > { %1803 = vmatmul.mubr.f32.gmra.mrb[26].mxu1 %v6428_v35 }
 0x1dd   : > { %1809 = vmatprep.mubr.f32.mxu1 %v6429_v28 }
 0x1de   : > { %3406 = vmatmul.mubr.msk.f32.gmra.mrb[30].mxu0 %vm6430_vm1, %v3970_v32 }
 0x1df   : > { %3407 = vmatprep.mubr.msk.f32.mxu0 %vm494_vm0, %v6355_v56  ;;  %v6438_v56 = vld [vmem:[#allocation81_spill] sm:$0xff] }
 0x1e0   : > { %1812 = vmatmul.mubr.f32.gmra.mrb[28].mxu1 %v6431_v4 }
 0x1e1   : > { %1818 = vmatprep.mubr.f32.mxu1 %v6432_v36 }
 0x1e2   : > { %3408 = vmatmul.mubr.msk.f32.gmra.mrb[32].mxu0 %vm6433_vm5, %v3970_v32 }
 0x1e3   : > { %3409 = vmatprep.mubr.msk.f32.mxu0 %vm494_vm0, %v6358_v15  ;;  %v6440_v15 = vld [vmem:[#allocation86_spill] sm:$0xff] }
 0x1e4   : > { %1821 = vmatmul.mubr.f32.gmra.mrb[30].mxu1 %v6434_v24 }
 0x1e5   : > { %1827 = vmatprep.mubr.f32.mxu1 %v6435_v25 }
 0x1e6   : > { %3410 = vmatmul.mubr.msk.f32.gmra.mrb[34].mxu0 %vm6436_vm7, %v3970_v32 }
 0x1e7   : > { %3411 = vmatprep.mubr.msk.f32.mxu0 %vm494_vm0, %v6361_v21  ;;  %v6442_v21 = vld [vmem:[#allocation92_spill] sm:$0xff] }
 0x1e8   : > { %1830 = vmatmul.mubr.f32.gmra.mrb[32].mxu1 %v6437_v39 }
 0x1e9   : > { %1836 = vmatprep.mubr.f32.mxu1 %v6438_v56 }
 0x1ea   : > { %3412 = vmatmul.mubr.msk.f32.gmra.mrb[36].mxu0 %vm314_vm2, %v3970_v32  ;;  %vm6443_vm2 = vcmp.eq.s32.totalorder %v6367_v58, %v4331_v22  ;;  %v6449_v58 = vld [vmem:[#allocation94_spill] sm:$0xff] }
 0x1eb   : > { %3413 = vmatprep.mubr.msk.f32.mxu0 %vm494_vm0, %v6364_v19  ;;  %v6445_v19 = vld [vmem:[#allocation97_spill] sm:$0xff] }
 0x1ec   : > { %1839 = vmatmul.mubr.f32.gmra.mrb[34].mxu1 %v6439_v1 }
 0x1ed   : > { %1845 = vmatprep.mubr.f32.mxu1 %v6440_v15 }
 0x1ee   : > { %3414 = vmatmul.mubr.msk.f32.gmra.mrb[38].mxu0 %vm316_vm4, %v3970_v32  ;;  %vm6446_vm4 = vcmp.eq.s32.totalorder %v6370_v51, %v4331_v22  ;;  %v6452_v51 = vld [vmem:[#allocation104_spill] sm:$0xff] }
 0x1ef   : > { %3415 = vmatprep.mubr.msk.f32.mxu0 %vm494_vm0, %v6366_v12  ;;  %v6448_v12 = vld [vmem:[#allocation96_spill] sm:$0xff] }
 0x1f0   : > { %1848 = vmatmul.mubr.f32.gmra.mrb[36].mxu1 %v6441_v16 }
 0x1f1   : > { %1854 = vmatprep.mubr.f32.mxu1 %v6442_v21 }
 0x1f2   : > { %3416 = vmatmul.mubr.msk.f32.gmra.mrb[40].mxu0 %vm6443_vm2, %v3970_v32 }
 0x1f3   : > { %3417 = vmatprep.mubr.msk.f32.mxu0 %vm494_vm0, %v6369_v14  ;;  %v6450_v14 = vld [vmem:[#allocation103_spill] sm:$0xff] }
 0x1f4   : > { %1857 = vmatmul.mubr.f32.gmra.mrb[38].mxu1 %v6444_v61 }
 0x1f5   : > { %1863 = vmatprep.mubr.f32.mxu1 %v6445_v19 }
 0x1f6   : > { %3418 = vmatmul.mubr.msk.f32.gmra.mrb[42].mxu0 %vm6446_vm4, %v3970_v32 }
 0x1f7   : > { %3419 = vmatprep.mubr.msk.f32.mxu0 %vm494_vm0, %v6373_v53  ;;  %v6453_v53 = vld [vmem:[#allocation102_spill] sm:$0xff] }
 0x1f8   : > { %1866 = vmatmul.mubr.f32.gmra.mrb[40].mxu1 %v6447_v54 }
 0x1f9   : > { %1872 = vmatprep.mubr.f32.mxu1 %v6448_v12 }
 0x1fa   : > { %3420 = vmatmul.mubr.msk.f32.gmra.mrb[44].mxu0 %vm322_vm10, %v3970_v32  ;;  %vm6454_vm10 = vcmp.eq.s32.totalorder %v6379_v30, %v4331_v22  ;;  %v6462_v30 = vld [vmem:[#allocation111_spill] sm:$0xff] }
 0x1fb   : > { %3421 = vmatprep.mubr.msk.f32.mxu0 %vm494_vm0, %v6376_v5  ;;  %v6455_v5 = vld [vmem:[#allocation101_spill] sm:$0xff] }
 0x1fc   : > { %1875 = vmatmul.mubr.f32.gmra.mrb[42].mxu1 %v6449_v58 }
 0x1fd   : > { %1881 = vmatprep.mubr.f32.mxu1 %v6450_v14 }
 0x1fe   : > { %3422 = vmatmul.mubr.msk.f32.gmra.mrb[46].mxu0 %vm6451_vm9, %v3970_v32 }
 0x1ff   : > { %3423 = vmatprep.mubr.msk.f32.mxu0 %vm494_vm0, %v4983_v59  ;;  %v6458_v59 = vld [vmem:[#allocation107_spill] sm:$0xff] }
 0x200   : > { %1884 = vmatmul.mubr.f32.gmra.mrb[44].mxu1 %v6452_v51 }
 0x201   : > { %1890 = vmatprep.mubr.f32.mxu1 %v6453_v53 }
 0x202   : > { %3424 = vmatmul.mubr.msk.f32.gmra.mrb[48].mxu0 %vm6454_vm10, %v3970_v32 }
 0x203   : > { %3425 = vmatprep.mubr.msk.f32.mxu0 %vm494_vm0, %v5022_v0  ;;  %v6461_v0 = vld [vmem:[#allocation110_spill] sm:$0xff] }
 0x204   : > { %1893 = vmatmul.mubr.f32.gmra.mrb[46].mxu1 %v6455_v5 }
 0x205   : > { %1899 = vmatprep.mubr.f32.mxu1 %v6456_v29 }
 0x206   : > { %3426 = vmatmul.mubr.msk.f32.gmra.mrb[50].mxu0 %vm6457_vm11, %v3970_v32 }
 0x207   : > { %3427 = vmatprep.mubr.msk.f32.mxu0 %vm494_vm0, %v5034_v43  ;;  %v6465_v43 = vld [vmem:[#allocation112_spill] sm:$0xff] }
 0x208   : > { %1902 = vmatmul.mubr.f32.gmra.mrb[48].mxu1 %v6458_v59 }
 0x209   : > { %1908 = vmatprep.mubr.f32.mxu1 %v6459_v9 }
 0x20a   : > { %3428 = vmatmul.mubr.msk.f32.gmra.mrb[52].mxu0 %vm6460_vm13, %v3970_v32 }
 0x20b   : > { %3429 = vmatprep.mubr.msk.f32.mxu0 %vm494_vm0, %v5078_v48  ;;  %v6469_v48 = vld [vmem:[#allocation116_spill] sm:$0xff] }
 0x20c   : > { %1911 = vmatmul.mubr.f32.gmra.mrb[50].mxu1 %v6461_v0 }
 0x20d   : > { %1917 = vmatprep.mubr.f32.mxu1 %v6462_v30 }
 0x20e   : > { %3430 = vmatmul.mubr.msk.f32.gmra.mrb[54].mxu0 %vm6464_vm15, %v3970_v32 }
 0x20f   : > { %3431 = vmatprep.mubr.msk.f32.mxu0 %vm494_vm0, %v5106_v2  ;;  %v6471_v2 = vld [vmem:[#allocation120_spill] sm:$0xff] }
 0x210   : > { %1920 = vmatmul.mubr.f32.gmra.mrb[52].mxu1 %v6465_v43 }
 0x211   : > { %1926 = vmatprep.mubr.f32.mxu1 %v6466_v41 }
 0x212   : > { %3432 = vmatmul.mubr.msk.f32.gmra.mrb[56].mxu0 %vm6468_vm14, %v3970_v32 }
 0x213   : > { %3433 = vmatprep.mubr.msk.f32.mxu0 %vm494_vm0, %v6388_v57  ;;  %v6474_v57 = vld [vmem:[#allocation121_spill] sm:$0xff] }
 0x214   : > { %1929 = vmatmul.mubr.f32.gmra.mrb[54].mxu1 %v6469_v48 }
 0x215   : > { %1935 = vmatprep.mubr.f32.mxu1 %v6470_v40 }
 0x216   : > { %3434 = vmatmul.mubr.msk.f32.gmra.mrb[58].mxu0 %vm336_vm8, %v3970_v32 }
 0x217   : > { %3435 = vmatprep.mubr.msk.f32.mxu0 %vm494_vm0, %v5150_v20  ;;  %v6476_v20 = vld [vmem:[#allocation123_spill] sm:$0xff] }
 0x218   : > { %1938 = vmatmul.mubr.f32.gmra.mrb[56].mxu1 %v6471_v2 }
 0x219   : > { %1944 = vmatprep.mubr.f32.mxu1 %v6472_v10 }
 0x21a   : > { %3436 = vmatmul.mubr.msk.f32.gmra.mrb[60].mxu0 %vm338_vm12, %v3970_v32 }
 0x21b   : > { %3437 = vmatprep.mubr.msk.f32.mxu0 %vm494_vm0, %v5167_v11  ;;  %vm3085_vm0 = vcmask 261120  }
 0x21c   : > { %1947 = vmatmul.mubr.f32.gmra.mrb[58].mxu1 %v6474_v57 }
 0x21d   : > { %1953 = vmatprep.mubr.f32.mxu1 %v6475_v7 }
 0x21e   : > { %3438 = vmatmul.mubr.msk.f32.gmra.mrb[62].mxu0 %vm340_vm6, %v3970_v32 }
 0x220   : > { %1956 = vmatmul.mubr.f32.gmra.mrb[60].mxu1 %v6476_v20 }
 0x221   : > { %1962 = vmatprep.mubr.f32.mxu1 %v6477_v3 }
 0x224   : > { %1965 = vmatmul.mubr.f32.gmra.mrb[62].mxu1 %v6478_v47 }
 0x275   : > { %v2864_v49 = vpop.f32.mrb[0].mxu0 }
 0x276   : > { %v2866_v62 = vpop.f32.mrb[1].mxu0 }
 0x279   : > { %v2871_v34 = vpop.f32.mrb[2].mxu0 }
 0x27a   : > { %v2873_v22 = vpop.f32.mrb[3].mxu0 }
 0x27b   : > { %v1687_v11 = vpop.f32.mrb[0].mxu1 }
 0x27c   : > { %v3657_v60 = vadd.f32 %v2864_v49, %v1687_v11  ;;  %v1689_v32 = vpop.f32.mrb[1].mxu1 }
 0x27d   : > { %v2878_v26 = vpop.f32.mrb[4].mxu0 }
 0x27e   : > { %3086 = vst.msk [vmem:[%s5912_s15] sm:$0xff] %vm3085_vm0, %v3657_v60  ;;  %v2880_v33 = vpop.f32.mrb[5].mxu0 }
 0x27f   : > { %v1696_v6 = vpop.f32.mrb[2].mxu1 }
 0x280   : > { %v3658_v52 = vadd.f32 %v2871_v34, %v1696_v6  ;;  %v1698_v63 = vpop.f32.mrb[3].mxu1 }
 0x281   : > { %v2885_v38 = vpop.f32.mrb[6].mxu0 }
 0x282   : > { %3087 = vst.msk [vmem:[%s5912_s15 + $0x8] sm:$0xff] %vm3085_vm0, %v3658_v52  ;;  %v2887_v55 = vpop.f32.mrb[7].mxu0 }
 0x283   : > { %v1705_v23 = vpop.f32.mrb[4].mxu1 }
 0x284   : > { %v3659_v45 = vadd.f32 %v2878_v26, %v1705_v23  ;;  %v1707_v17 = vpop.f32.mrb[5].mxu1 }
 0x285   : > { %v2892_v18 = vpop.f32.mrb[8].mxu0 }
 0x286   : > { %3088 = vst.msk [vmem:[%s5912_s15 + $0x10] sm:$0xff] %vm3085_vm0, %v3659_v45  ;;  %v2894_v37 = vpop.f32.mrb[9].mxu0 }
 0x287   : > { %v1714_v46 = vpop.f32.mrb[6].mxu1 }
 0x288   : > { %v3660_v44 = vadd.f32 %v2885_v38, %v1714_v46  ;;  %v1716_v42 = vpop.f32.mrb[7].mxu1 }
 0x289   : > { %v2899_v31 = vpop.f32.mrb[10].mxu0 }
 0x28a   : > { %3089 = vst.msk [vmem:[%s5912_s15 + $0x18] sm:$0xff] %vm3085_vm0, %v3660_v44  ;;  %v2901_v35 = vpop.f32.mrb[11].mxu0 }
 0x28b   : > { %v1723_v50 = vpop.f32.mrb[8].mxu1 }
 0x28c   : > { %v3661_v28 = vadd.f32 %v2892_v18, %v1723_v50  ;;  %v1725_v4 = vpop.f32.mrb[9].mxu1 }
 0x28d   : > { %v2906_v36 = vpop.f32.mrb[12].mxu0 }
 0x28e   : > { %3090 = vst.msk [vmem:[%s5912_s15 + $0x20] sm:$0xff] %vm3085_vm0, %v3661_v28  ;;  %v2908_v25 = vpop.f32.mrb[13].mxu0 }
 0x28f   : > { %v1732_v24 = vpop.f32.mrb[10].mxu1 }
 0x290   : > { %v3662_v39 = vadd.f32 %v2899_v31, %v1732_v24  ;;  %v1734_v56 = vpop.f32.mrb[11].mxu1 }
 0x291   : > { %v2913_v1 = vpop.f32.mrb[14].mxu0 }
 0x292   : > { %3091 = vst.msk [vmem:[%s5912_s15 + $0x28] sm:$0xff] %vm3085_vm0, %v3662_v39  ;;  %v2915_v16 = vpop.f32.mrb[15].mxu0 }
 0x293   : > { %v1741_v15 = vpop.f32.mrb[12].mxu1 }
 0x294   : > { %v3663_v21 = vadd.f32 %v2906_v36, %v1741_v15  ;;  %v1743_v61 = vpop.f32.mrb[13].mxu1 }
 0x295   : > { %v2920_v19 = vpop.f32.mrb[16].mxu0 }
 0x296   : > { %3092 = vst.msk [vmem:[%s5912_s15 + $0x30] sm:$0xff] %vm3085_vm0, %v3663_v21  ;;  %v2922_v12 = vpop.f32.mrb[17].mxu0 }
 0x297   : > { %v1750_v54 = vpop.f32.mrb[14].mxu1 }
 0x298   : > { %v3664_v58 = vadd.f32 %v2913_v1, %v1750_v54  ;;  %v1752_v14 = vpop.f32.mrb[15].mxu1 }
 0x299   : > { %v2927_v51 = vpop.f32.mrb[18].mxu0 }
 0x29a   : > { %3093 = vst.msk [vmem:[%s5912_s15 + $0x38] sm:$0xff] %vm3085_vm0, %v3664_v58  ;;  %v2929_v5 = vpop.f32.mrb[19].mxu0 }
 0x29b   : > { %v1759_v53 = vpop.f32.mrb[16].mxu1 }
 0x29c   : > { %v3665_v29 = vadd.f32 %v2920_v19, %v1759_v53  ;;  %v1761_v59 = vpop.f32.mrb[17].mxu1 }
 0x29d   : > { %v2934_v9 = vpop.f32.mrb[20].mxu0 }
 0x29e   : > { %3094 = vst.msk [vmem:[%s5912_s15 + $0x40] sm:$0xff] %vm3085_vm0, %v3665_v29  ;;  %v2936_v30 = vpop.f32.mrb[21].mxu0 }
 0x29f   : > { %v1768_v0 = vpop.f32.mrb[18].mxu1 }
 0x2a0   : > { %v3666_v13 = vadd.f32 %v2927_v51, %v1768_v0  ;;  %v1770_v43 = vpop.f32.mrb[19].mxu1 }
 0x2a1   : > { %v2941_v41 = vpop.f32.mrb[22].mxu0 }
 0x2a2   : > { %3095 = vst.msk [vmem:[%s5912_s15 + $0x48] sm:$0xff] %vm3085_vm0, %v3666_v13  ;;  %v2943_v48 = vpop.f32.mrb[23].mxu0 }
 0x2a3   : > { %v1777_v8 = vpop.f32.mrb[20].mxu1 }
 0x2a4   : > { %v3667_v40 = vadd.f32 %v2934_v9, %v1777_v8  ;;  %v1779_v2 = vpop.f32.mrb[21].mxu1 }
 0x2a5   : > { %v2948_v10 = vpop.f32.mrb[24].mxu0 }
 0x2a6   : > { %3096 = vst.msk [vmem:[%s5912_s15 + $0x50] sm:$0xff] %vm3085_vm0, %v3667_v40  ;;  %v2950_v57 = vpop.f32.mrb[25].mxu0 }
 0x2a7   : > { %v1786_v27 = vpop.f32.mrb[22].mxu1 }
 0x2a8   : > { %v3668_v7 = vadd.f32 %v2941_v41, %v1786_v27  ;;  %v1788_v20 = vpop.f32.mrb[23].mxu1 }
 0x2a9   : > { %v2955_v3 = vpop.f32.mrb[26].mxu0 }
 0x2aa   : > { %3097 = vst.msk [vmem:[%s5912_s15 + $0x58] sm:$0xff] %vm3085_vm0, %v3668_v7  ;;  %v2957_v49 = vpop.f32.mrb[27].mxu0 }
 0x2ab   : > { %v1795_v47 = vpop.f32.mrb[24].mxu1 }
 0x2ac   : > { %v3669_v62 = vadd.f32 %v2948_v10, %v1795_v47  ;;  %v1797_v34 = vpop.f32.mrb[25].mxu1 }
 0x2ad   : > { %v2962_v11 = vpop.f32.mrb[28].mxu0 }
 0x2ae   : > { %3098 = vst.msk [vmem:[%s5912_s15 + $0x60] sm:$0xff] %vm3085_vm0, %v3669_v62  ;;  %v2964_v60 = vpop.f32.mrb[29].mxu0 }
 0x2af   : > { %v1804_v22 = vpop.f32.mrb[26].mxu1 }
 0x2b0   : > { %v3670_v32 = vadd.f32 %v2955_v3, %v1804_v22  ;;  %v1806_v26 = vpop.f32.mrb[27].mxu1 }
 0x2b1   : > { %v2969_v6 = vpop.f32.mrb[30].mxu0 }
 0x2b2   : > { %3099 = vst.msk [vmem:[%s5912_s15 + $0x68] sm:$0xff] %vm3085_vm0, %v3670_v32  ;;  %v2971_v52 = vpop.f32.mrb[31].mxu0 }
 0x2b3   : > { %v1813_v33 = vpop.f32.mrb[28].mxu1 }
 0x2b4   : > { %v3671_v63 = vadd.f32 %v2962_v11, %v1813_v33  ;;  %v1815_v38 = vpop.f32.mrb[29].mxu1 }
 0x2b5   : > { %v2976_v23 = vpop.f32.mrb[32].mxu0 }
 0x2b6   : > { %3100 = vst.msk [vmem:[%s5912_s15 + $0x70] sm:$0xff] %vm3085_vm0, %v3671_v63  ;;  %v2978_v45 = vpop.f32.mrb[33].mxu0 }
 0x2b7   : > { %v1822_v55 = vpop.f32.mrb[30].mxu1 }
 0x2b8   : > { %v3672_v17 = vadd.f32 %v2969_v6, %v1822_v55  ;;  %v1824_v18 = vpop.f32.mrb[31].mxu1 }
 0x2b9   : > { %v2983_v46 = vpop.f32.mrb[34].mxu0 }
 0x2ba   : > { %3101 = vst.msk [vmem:[%s5912_s15 + $0x78] sm:$0xff] %vm3085_vm0, %v3672_v17  ;;  %v2985_v44 = vpop.f32.mrb[35].mxu0 }
 0x2bb   : > { %v1831_v37 = vpop.f32.mrb[32].mxu1 }
 0x2bc   : > { %v3673_v42 = vadd.f32 %v2976_v23, %v1831_v37  ;;  %v1833_v31 = vpop.f32.mrb[33].mxu1 }
 0x2bd   : > { %v2990_v50 = vpop.f32.mrb[36].mxu0 }
 0x2be   : > { %3102 = vst.msk [vmem:[%s5912_s15 + $0x80] sm:$0xff] %vm3085_vm0, %v3673_v42  ;;  %v2992_v28 = vpop.f32.mrb[37].mxu0 }
 0x2bf   : > { %v1840_v35 = vpop.f32.mrb[34].mxu1 }
 0x2c0   : > { %v3674_v4 = vadd.f32 %v2983_v46, %v1840_v35  ;;  %v1842_v36 = vpop.f32.mrb[35].mxu1 }
 0x2c1   : > { %v2997_v24 = vpop.f32.mrb[38].mxu0 }
 0x2c2   : > { %3103 = vst.msk [vmem:[%s5912_s15 + $0x88] sm:$0xff] %vm3085_vm0, %v3674_v4  ;;  %v2999_v39 = vpop.f32.mrb[39].mxu0 }
 0x2c3   : > { %v1849_v25 = vpop.f32.mrb[36].mxu1 }
 0x2c4   : > { %v3675_v56 = vadd.f32 %v2990_v50, %v1849_v25  ;;  %v1851_v1 = vpop.f32.mrb[37].mxu1 }
 0x2c5   : > { %v3004_v15 = vpop.f32.mrb[40].mxu0 }
 0x2c6   : > { %3104 = vst.msk [vmem:[%s5912_s15 + $0x90] sm:$0xff] %vm3085_vm0, %v3675_v56  ;;  %v3006_v21 = vpop.f32.mrb[41].mxu0 }
 0x2c7   : > { %v1858_v16 = vpop.f32.mrb[38].mxu1 }
 0x2c8   : > { %v3676_v61 = vadd.f32 %v2997_v24, %v1858_v16  ;;  %v1860_v19 = vpop.f32.mrb[39].mxu1 }
 0x2c9   : > { %v3011_v54 = vpop.f32.mrb[42].mxu0 }
 0x2ca   : > { %3105 = vst.msk [vmem:[%s5912_s15 + $0x98] sm:$0xff] %vm3085_vm0, %v3676_v61  ;;  %v3013_v58 = vpop.f32.mrb[43].mxu0 }
 0x2cb   : > { %v1867_v12 = vpop.f32.mrb[40].mxu1 }
 0x2cc   : > { %v3677_v14 = vadd.f32 %v3004_v15, %v1867_v12  ;;  %v1869_v51 = vpop.f32.mrb[41].mxu1 }
 0x2cd   : > { %v3018_v53 = vpop.f32.mrb[44].mxu0 }
 0x2ce   : > { %3106 = vst.msk [vmem:[%s5912_s15 + $0xa0] sm:$0xff] %vm3085_vm0, %v3677_v14  ;;  %v3020_v29 = vpop.f32.mrb[45].mxu0 }
 0x2cf   : > { %v1876_v5 = vpop.f32.mrb[42].mxu1 }
 0x2d0   : > { %v3678_v59 = vadd.f32 %v3011_v54, %v1876_v5  ;;  %v1878_v9 = vpop.f32.mrb[43].mxu1 }
 0x2d1   : > { %v3025_v0 = vpop.f32.mrb[46].mxu0 }
 0x2d2   : > { %3107 = vst.msk [vmem:[%s5912_s15 + $0xa8] sm:$0xff] %vm3085_vm0, %v3678_v59  ;;  %v3027_v13 = vpop.f32.mrb[47].mxu0 }
 0x2d3   : > { %v1885_v30 = vpop.f32.mrb[44].mxu1 }
 0x2d4   : > { %v3679_v43 = vadd.f32 %v3018_v53, %v1885_v30  ;;  %v1887_v41 = vpop.f32.mrb[45].mxu1 }
 0x2d5   : > { %v3032_v8 = vpop.f32.mrb[48].mxu0 }
 0x2d6   : > { %3108 = vst.msk [vmem:[%s5912_s15 + $0xb0] sm:$0xff] %vm3085_vm0, %v3679_v43  ;;  %v3034_v40 = vpop.f32.mrb[49].mxu0 }
 0x2d7   : > { %v1894_v48 = vpop.f32.mrb[46].mxu1 }
 0x2d8   : > { %v3680_v2 = vadd.f32 %v3025_v0, %v1894_v48  ;;  %v1896_v10 = vpop.f32.mrb[47].mxu1 }
 0x2d9   : > { %v3039_v27 = vpop.f32.mrb[50].mxu0 }
 0x2da   : > { %3109 = vst.msk [vmem:[%s5912_s15 + $0xb8] sm:$0xff] %vm3085_vm0, %v3680_v2  ;;  %v3041_v7 = vpop.f32.mrb[51].mxu0 }
 0x2db   : > { %v1903_v57 = vpop.f32.mrb[48].mxu1 }
 0x2dc   : > { %v3681_v20 = vadd.f32 %v3032_v8, %v1903_v57  ;;  %v1905_v3 = vpop.f32.mrb[49].mxu1 }
 0x2dd   : > { %v3046_v47 = vpop.f32.mrb[52].mxu0 }
 0x2de   : > { %3110 = vst.msk [vmem:[%s5912_s15 + $0xc0] sm:$0xff] %vm3085_vm0, %v3681_v20  ;;  %v3048_v62 = vpop.f32.mrb[53].mxu0 }
 0x2df   : > { %v1912_v49 = vpop.f32.mrb[50].mxu1 }
 0x2e0   : > { %v3682_v34 = vadd.f32 %v3039_v27, %v1912_v49  ;;  %v1914_v11 = vpop.f32.mrb[51].mxu1 }
 0x2e1   : > { %v3053_v22 = vpop.f32.mrb[54].mxu0 }
 0x2e2   : > { %3111 = vst.msk [vmem:[%s5912_s15 + $0xc8] sm:$0xff] %vm3085_vm0, %v3682_v34  ;;  %v3055_v32 = vpop.f32.mrb[55].mxu0 }
 0x2e3   : > { %v1921_v60 = vpop.f32.mrb[52].mxu1 }
 0x2e4   : > { %v3683_v26 = vadd.f32 %v3046_v47, %v1921_v60  ;;  %v1923_v6 = vpop.f32.mrb[53].mxu1 }
 0x2e5   : > { %v3060_v33 = vpop.f32.mrb[56].mxu0 }
 0x2e6   : > { %3112 = vst.msk [vmem:[%s5912_s15 + $0xd0] sm:$0xff] %vm3085_vm0, %v3683_v26  ;;  %v3062_v63 = vpop.f32.mrb[57].mxu0 }
 0x2e7   : > { %v1930_v52 = vpop.f32.mrb[54].mxu1 }
 0x2e8   : > { %v3684_v38 = vadd.f32 %v3053_v22, %v1930_v52  ;;  %v1932_v23 = vpop.f32.mrb[55].mxu1 }
 0x2e9   : > { %v3067_v55 = vpop.f32.mrb[58].mxu0 }
 0x2ea   : > { %3113 = vst.msk [vmem:[%s5912_s15 + $0xd8] sm:$0xff] %vm3085_vm0, %v3684_v38  ;;  %v3069_v17 = vpop.f32.mrb[59].mxu0 }
 0x2eb   : > { %v1939_v45 = vpop.f32.mrb[56].mxu1 }
 0x2ec   : > { %v3685_v18 = vadd.f32 %v3060_v33, %v1939_v45  ;;  %v1941_v46 = vpop.f32.mrb[57].mxu1 }
 0x2ed   : > { %v3074_v37 = vpop.f32.mrb[60].mxu0 }
 0x2ee   : > { %3114 = vst.msk [vmem:[%s5912_s15 + $0xe0] sm:$0xff] %vm3085_vm0, %v3685_v18  ;;  %v3076_v42 = vpop.f32.mrb[61].mxu0 }
 0x2ef   : > { %v1948_v44 = vpop.f32.mrb[58].mxu1 }
 0x2f0   : > { %v3686_v31 = vadd.f32 %v3067_v55, %v1948_v44  ;;  %v1950_v50 = vpop.f32.mrb[59].mxu1 }
 0x2f1   : > { %v3081_v35 = vpop.f32.mrb[62].mxu0 }
 0x2f2   : > { %3115 = vst.msk [vmem:[%s5912_s15 + $0xe8] sm:$0xff] %vm3085_vm0, %v3686_v31  ;;  %v3083_v4 = vpop.f32.mrb[63].mxu0 }
 0x2f3   : > { %v1957_v28 = vpop.f32.mrb[60].mxu1 }
 0x2f4   : > { %v3687_v36 = vadd.f32 %v3074_v37, %v1957_v28  ;;  %v1959_v24 = vpop.f32.mrb[61].mxu1 }
 0x2f6   : > { %3116 = vst.msk [vmem:[%s5912_s15 + $0xf0] sm:$0xff] %vm3085_vm0, %v3687_v36 }
 0x2f7   : > { %v1966_v25 = vpop.f32.mrb[62].mxu1 }
 0x2f8   : > { %v3688_v39 = vadd.f32 %v3081_v35, %v1966_v25  ;;  %v1968_v56 = vpop.f32.mrb[63].mxu1 }
 0x2fa   : > { %3117 = vst.msk [vmem:[%s5912_s15 + $0xf8] sm:$0xff] %vm3085_vm0, %v3688_v39 }
 0x2fb PF: > { %s12_s9 = sadd.s32 1, %s3965_s9  }
 0x2fc   : > { %p9_p4 = scmp.ge.s32.totalorder %s12_s9, 4  }
 0x2fe   :  { %11 = sbr.rel (!%p9_p4) target bundleno = 1 (0x1), region = 58 }

</bundles_post_ra>
